<compile_context>
chip_gen: v6e
topology: v6e:2x2x1
jax: 0.10.0
libtpu: 0.0.40
codegen_flags: <defaults>
</compile_context>

<pallas_src>
import math

import jax
import jax.numpy as jnp
from jax import lax
from jax.experimental import pallas as pl
from jax.experimental.pallas import tpu as pltpu

LN_EPS = 1e-5


# ---------------------------------------------------------------------------
# VMEM budgeting / tile selection
# ---------------------------------------------------------------------------

def _vmem_capacity_bytes(default=64 * 1024 * 1024):
    try:
        return int(pltpu.get_tpu_info().vmem_capacity_bytes)
    except Exception:
        return default


def _per_step_vmem_bytes(batch_tile, seq_len, embed_dim, out_bytes):
    """Rough per-grid-step VMEM bytes: double-buffered bf16 input tiles,
    double-buffered output tile, and a conservative bound on the kernel's
    simultaneously-live intermediates (f32 upcasts, two fused f32 projection
    accumulators, bf16 q/k_cat/v_cat, per-head f32 scores)."""
    m = batch_tile * seq_len
    c = embed_dim
    act_io = 2 * (m * c * 2) * 2            # ta, ts bf16, 2 buffers each
    out_io = (m * c * out_bytes) * 2        # output, 2 buffers
    interm = 48 * m * c + 24 * batch_tile * seq_len * seq_len
    return act_io + out_io + interm


def _choose_batch_tile(bs, seq_len, embed_dim, out_bytes, budget_bytes,
                       weight_bytes):
    """Largest divisor of bs that (a) leaves >=4 grid steps when bs allows
    (>=2 steps per TensorCore on v7x megacore; >=2 steps otherwise so DMA
    prefetch has something to hide behind) and (b) fits the VMEM budget."""
    if bs >= 4:
        min_steps = 4
    elif bs >= 2:
        min_steps = 2
    else:
        min_steps = 1
    candidates = [d for d in range(1, bs + 1)
                  if bs % d == 0 and bs // d >= min_steps]
    if not candidates:
        candidates = [1]
    best = None
    for d in sorted(candidates):
        if weight_bytes + _per_step_vmem_bytes(d, seq_len, embed_dim,
                                               out_bytes) <= budget_bytes:
            best = d
    if best is None:
        # TODO(synk): tile over N (q blocks / flash kv axis) when a single
        # sequence alone exceeds the VMEM budget.
        raise ValueError(
            "TSAttention Pallas kernel: even batch_tile=1 exceeds the VMEM "
            "budget; sequence tiling over N is required for this shape.")
    return best


# ---------------------------------------------------------------------------
# Parameter preparation (ONE-TIME; hoisted out of the per-call path)
# ---------------------------------------------------------------------------

def prepare_ts_attention_params(params, num_heads):
    """Concatenate the 5 projection weights into two fused matrices, fold the
    1/sqrt(head_dim) softmax scale into the q columns, and cast to bf16.
    Call once and cache; do NOT call per forward pass."""
    C = params["wq"].shape[0]
    assert C % num_heads == 0
    scale = 1.0 / math.sqrt(C // num_heads)
    bf16 = jnp.bfloat16
    w_ts3 = jnp.concatenate(
        [params["wq"] * scale, params["wk_ts"], params["wv_ts"]], axis=1
    ).astype(bf16)                                            # (C, 3C)
    w_ta2 = jnp.concatenate(
        [params["wk_ta"], params["wv_ta"]], axis=1
    ).astype(bf16)                                            # (C, 2C)
    return {
        "w_ts3": w_ts3,
        "w_ta2": w_ta2,
        "g_ta": params["g_ta"].astype(jnp.float32),
        "b_ta": params["b_ta"].astype(jnp.float32),
        "g_ts": params["g_ts"].astype(jnp.float32),
        "b_ts": params["b_ts"].astype(jnp.float32),
    }


# ---------------------------------------------------------------------------
# Kernel
# ---------------------------------------------------------------------------

def _make_kernel(num_heads: int, head_dim: int, batch_tile: int, seq_len: int):
    C = num_heads * head_dim
    B, N = batch_tile, seq_len
    M = B * N

    def kernel(ta_ref, ts_ref, wts3_ref, wta2_ref,
               gta_ref, bta_ref, gts_ref, bts_ref, out_ref):
        bf16 = jnp.bfloat16
        # bf16 activation tiles -> f32 for LayerNorm; fold batch into rows.
        # (Reshape is layout-free when N % 8 == 0; otherwise it is a copy.)
        ta = ta_ref[...].astype(jnp.float32).reshape(M, C)
        ts = ts_ref[...].astype(jnp.float32).reshape(M, C)

        def layer_norm(x, g, b):  # f32 arithmetic (v5e VPU/EUP lack bf16)
            mu = jnp.mean(x, axis=-1, keepdims=True)
            xc = x - mu
            var = jnp.mean(xc * xc, axis=-1, keepdims=True)
            return xc * lax.rsqrt(var + LN_EPS) * g + b

        ta_n = layer_norm(ta, gta_ref[...], bta_ref[...]).astype(bf16)
        ts_n = layer_norm(ts, gts_ref[...], bts_ref[...]).astype(bf16)

        # Two fused projections (bf16 operands, f32 MXU accumulation):
        #   ts_n @ [wq*scale | wk_ts | wv_ts]  and  ta_n @ [wk_ta | wv_ta]
        qkv_ts = jnp.dot(ts_n, wts3_ref[...],
                         preferred_element_type=jnp.float32)   # (M, 3C)
        kv_ta = jnp.dot(ta_n, wta2_ref[...],
                        preferred_element_type=jnp.float32)    # (M, 2C)

        # Cast each projection result to bf16 immediately (softmax scale is
        # already folded into the q weight columns).
        q    = qkv_ts[:, 0 * C:1 * C].astype(bf16).reshape(B, N, C)
        k_ts = qkv_ts[:, 1 * C:2 * C].astype(bf16).reshape(B, N, C)
        v_ts = qkv_ts[:, 2 * C:3 * C].astype(bf16).reshape(B, N, C)
        k_ta = kv_ta[:, 0 * C:1 * C].astype(bf16).reshape(B, N, C)
        v_ta = kv_ta[:, 1 * C:2 * C].astype(bf16).reshape(B, N, C)

        # Keys/values: ta rows first, then ts rows (matches
        # torch.cat((k_ta, k_ts), dim=2) after the head transpose).
        k_cat = jnp.concatenate([k_ta, k_ts], axis=1)          # (B, 2N, C)
        v_cat = jnp.concatenate([v_ta, v_ts], axis=1)          # (B, 2N, C)

        # Per-head attention, batched over the B sequences of this tile.
        # (Mosaic dot_general lowering supports a single leading batch dim;
        # the multi-batch-dim 'bqhd,bkhd->bhqk' form does not lower.)
        outs = []
        for h in range(num_heads):
            sl = slice(h * head_dim, (h + 1) * head_dim)
            s = jnp.einsum("bqd,bkd->bqk", q[:, :, sl], k_cat[:, :, sl],
                           preferred_element_type=jnp.float32)  # (B, N, 2N)
            s = s - jnp.max(s, axis=-1, keepdims=True)           # f32 softmax
            p = jnp.exp(s)
            denom = jnp.sum(p, axis=-1, keepdims=True)
            p = (p * pl.reciprocal(denom, approx=True)).astype(bf16)
            outs.append(jnp.einsum("bqk,bkd->bqd", p, v_cat[:, :, sl],
                                   preferred_element_type=jnp.float32))

        # Single lane-dense store of the full (B, N, C) output tile.
        out_ref[...] = jnp.concatenate(outs, axis=-1).astype(out_ref.dtype)

    return kernel


# ---------------------------------------------------------------------------
# Wrapper
# ---------------------------------------------------------------------------

def ts_attention_pallas(ta, ts, prepared, num_heads, *,
                        out_dtype=jnp.float32, batch_tile=None):
    """Forward pass matching TSAttention.forward.

    `prepared` is the output of prepare_ts_attention_params (bf16 fused
    weights, prepared ONCE).  Pass `ta`/`ts` in bf16 to avoid an extra
    wrapper-side convert; the kernel upcasts to f32 for LayerNorm/softmax.
    """
    bs, N, C = ta.shape
    assert ts.shape == (bs, N, C)
    assert C % num_heads == 0
    head_dim = C // num_heads

    # bf16 streaming inputs (no-op if the caller already passes bf16).
    if ta.dtype != jnp.bfloat16:
        ta = ta.astype(jnp.bfloat16)
    if ts.dtype != jnp.bfloat16:
        ts = ts.astype(jnp.bfloat16)

    out_bytes = jnp.dtype(out_dtype).itemsize
    capacity = _vmem_capacity_bytes()
    # Generation-aware limit: ~48 MiB usable on v7x (64 MiB VMEM),
    # ~112 MiB on v5e/v6e (128 MiB VMEM).
    vmem_limit = max(32 * 1024 * 1024, capacity - 16 * 1024 * 1024)
    budget = int(vmem_limit * 0.9)
    weight_bytes = (3 * C * C + 2 * C * C) * 2 + 4 * C * 4  # bf16 weights + LN

    if batch_tile is None:
        batch_tile = _choose_batch_tile(bs, N, C, out_bytes, budget,
                                        weight_bytes)
    assert bs % batch_tile == 0
    grid_b = bs // batch_tile

    kernel = _make_kernel(num_heads, head_dim, batch_tile, N)
    seq_spec = pl.BlockSpec((batch_tile, N, C), lambda b: (b, 0, 0))

    def run(single_buffer_consts):
        # Constant-index operands (weights / LN params) never change across the
        # grid -> single-buffer them to reclaim VMEM.
        const_kw = ({"pipeline_mode": pl.Buffered(1)}
                    if single_buffer_consts else {})
        w3_spec = pl.BlockSpec((C, 3 * C), lambda b: (0, 0), **const_kw)
        w2_spec = pl.BlockSpec((C, 2 * C), lambda b: (0, 0), **const_kw)
        ln_spec = pl.BlockSpec((1, C), lambda b: (0, 0), **const_kw)

        fn = pl.pallas_call(
            kernel,
            out_shape=jax.ShapeDtypeStruct((bs, N, C), out_dtype),
            grid_spec=pltpu.PrefetchScalarGridSpec(
                num_scalar_prefetch=0,
                grid=(grid_b,),
                in_specs=[seq_spec, seq_spec, w3_spec, w2_spec,
                          ln_spec, ln_spec, ln_spec, ln_spec],
                out_specs=seq_spec,
            ),
            compiler_params=pltpu.CompilerParams(
                dimension_semantics=("parallel",),
                vmem_limit_bytes=int(vmem_limit)),
        )
        out = fn(ta, ts, prepared["w_ts3"], prepared["w_ta2"],
                 prepared["g_ta"], prepared["b_ta"],
                 prepared["g_ts"], prepared["b_ts"])
        return jax.block_until_ready(out)

    try:
        return run(True)
    except Exception:
        # This JAX build rejected single-buffered (Buffered(1)) operands —
        # fall back to default double-buffering (correctness identical).
        return run(False)


# ---------------------------------------------------------------------------
# Pure-JAX reference and parameter init (mirror the PyTorch module)
# ---------------------------------------------------------------------------

def ts_attention_ref(ta, ts, p, num_heads):
    def layer_norm(x, g, b):
        mu = x.mean(-1, keepdims=True)
        var = ((x - mu) ** 2).mean(-1, keepdims=True)
        return (x - mu) / jnp.sqrt(var + LN_EPS) * g + b

    bs, N, C = ta.shape
    d = C // num_heads
    ta_n = layer_norm(ta, p["g_ta"], p["b_ta"])
    ts_n = layer_norm(ts, p["g_ts"], p["b_ts"])

    def split(x):  # (bs, N, C) -> (bs, H, N, d)
        return x.reshape(bs, N, num_heads, d).transpose(0, 2, 1, 3)

    q = split(ts_n @ p["wq"])
    k = jnp.concatenate([split(ta_n @ p["wk_ta"]), split(ts_n @ p["wk_ts"])], axis=2)
    v = jnp.concatenate([split(ta_n @ p["wv_ta"]), split(ts_n @ p["wv_ts"])], axis=2)
    s = jnp.einsum("bhnd,bhmd->bhnm", q, k) / math.sqrt(d)
    a = jax.nn.softmax(s, axis=-1)
    o = jnp.einsum("bhnm,bhmd->bhnd", a, v)
    return o.transpose(0, 2, 1, 3).reshape(bs, N, C)


def init_params(key, embed_dim):
    # xavier_normal_ for a square (C, C) weight: std = sqrt(2 / (C + C))
    std = math.sqrt(2.0 / (2.0 * embed_dim))
    keys = jax.random.split(key, 5)
    names = ["wq", "wk_ts", "wk_ta", "wv_ts", "wv_ta"]
    params = {n: (jax.random.normal(k, (embed_dim, embed_dim), jnp.float32) * std)
              for n, k in zip(names, keys)}
    # LayerNorm.reset_parameters(): weight=1, bias=0 (stored as (1, C))
    params["g_ta"] = jnp.ones((1, embed_dim), jnp.float32)
    params["b_ta"] = jnp.zeros((1, embed_dim), jnp.float32)
    params["g_ts"] = jnp.ones((1, embed_dim), jnp.float32)
    params["b_ts"] = jnp.zeros((1, embed_dim), jnp.float32)
    return params


if __name__ == "__main__":
    bs, N, C, num_heads = 2, 8, 32, 4

    key = jax.random.PRNGKey(0)
    k_ta, k_ts, k_p = jax.random.split(key, 3)
    ta_f32 = jax.random.normal(k_ta, (bs, N, C), jnp.float32)
    ts_f32 = jax.random.normal(k_ts, (bs, N, C), jnp.float32)
    params = init_params(k_p, C)

    # One-time weight fusion / bf16 cast (hoisted out of the per-call path).
    prepared = prepare_ts_attention_params(params, num_heads)

    # bf16 activations at the kernel boundary (an upstream layer would already
    # produce bf16); the reference is evaluated on the same quantized inputs.
    ta_bf = ta_f32.astype(jnp.bfloat16)
    ts_bf = ts_f32.astype(jnp.bfloat16)

    out = ts_attention_pallas(ta_bf, ts_bf, prepared, num_heads)
    out = jax.block_until_ready(out)

    ref = ts_attention_ref(ta_bf.astype(jnp.float32), ts_bf.astype(jnp.float32),
                           params, num_heads)
    assert out.shape == (bs, N, C)
    # Tolerance covers bf16 MXU operands and the approximate EUP reciprocal in
    # the softmax denominator (denominator >= 1 after max-subtraction, so the
    # approximation error is bounded); LN/softmax arithmetic is f32.
    assert jnp.allclose(out, ref, atol=3e-2, rtol=3e-2), "mismatch vs reference"

    print("KERNEL_OK")
</pallas_src>

<mosaic_0001>
module attributes {stable_mosaic.version = 11 : i64} {
  func.func @kernel(%arg0: i32, %arg1: memref<1x8x32xbf16, #tpu.memory_space<vmem>>, %arg2: memref<1x8x32xbf16, #tpu.memory_space<vmem>>, %arg3: memref<32x96xbf16, #tpu.memory_space<vmem>>, %arg4: memref<32x64xbf16, #tpu.memory_space<vmem>>, %arg5: memref<1x32xf32, #tpu.memory_space<vmem>>, %arg6: memref<1x32xf32, #tpu.memory_space<vmem>>, %arg7: memref<1x32xf32, #tpu.memory_space<vmem>>, %arg8: memref<1x32xf32, #tpu.memory_space<vmem>>, %arg9: memref<1x8x32xf32, #tpu.memory_space<vmem>>) attributes {dimension_semantics = [#tpu.dimension_semantics<parallel>], iteration_bounds = array<i64: 2>, scalar_prefetch = 0 : i64, scratch_operands = 0 : i64, tpu.core_type = #tpu.core_type<tc>, window_params = [{transform_indices = @transform_0, window_bounds = array<i64: 1, 8, 32>}, {transform_indices = @transform_1, window_bounds = array<i64: 1, 8, 32>}, {pipeline_mode = #tpu.pipeline_mode<synchronous>, transform_indices = @transform_2, window_bounds = array<i64: 32, 96>}, {pipeline_mode = #tpu.pipeline_mode<synchronous>, transform_indices = @transform_3, window_bounds = array<i64: 32, 64>}, {pipeline_mode = #tpu.pipeline_mode<synchronous>, transform_indices = @transform_4, window_bounds = array<i64: 1, 32>}, {pipeline_mode = #tpu.pipeline_mode<synchronous>, transform_indices = @transform_5, window_bounds = array<i64: 1, 32>}, {pipeline_mode = #tpu.pipeline_mode<synchronous>, transform_indices = @transform_6, window_bounds = array<i64: 1, 32>}, {pipeline_mode = #tpu.pipeline_mode<synchronous>, transform_indices = @transform_7, window_bounds = array<i64: 1, 32>}, {transform_indices = @transform_8, window_bounds = array<i64: 1, 8, 32>}]} {
    %c0 = arith.constant 0 : index
    %c0_0 = arith.constant 0 : index
    %c0_1 = arith.constant 0 : index
    %0 = vector.load %arg1[%c0, %c0_0, %c0_1] : memref<1x8x32xbf16, #tpu.memory_space<vmem>>, vector<1x8x32xbf16>
    %1 = arith.extf %0 : vector<1x8x32xbf16> to vector<1x8x32xf32>
    %2 = vector.shape_cast %1 : vector<1x8x32xf32> to vector<8x32xf32>
    %c0_2 = arith.constant 0 : index
    %c0_3 = arith.constant 0 : index
    %c0_4 = arith.constant 0 : index
    %3 = vector.load %arg2[%c0_2, %c0_3, %c0_4] : memref<1x8x32xbf16, #tpu.memory_space<vmem>>, vector<1x8x32xbf16>
    %4 = arith.extf %3 : vector<1x8x32xbf16> to vector<1x8x32xf32>
    %5 = vector.shape_cast %4 : vector<1x8x32xf32> to vector<8x32xf32>
    %c0_5 = arith.constant 0 : index
    %c0_6 = arith.constant 0 : index
    %6 = vector.load %arg5[%c0_5, %c0_6] : memref<1x32xf32, #tpu.memory_space<vmem>>, vector<1x32xf32>
    %c0_7 = arith.constant 0 : index
    %c0_8 = arith.constant 0 : index
    %7 = vector.load %arg6[%c0_7, %c0_8] : memref<1x32xf32, #tpu.memory_space<vmem>>, vector<1x32xf32>
    %cst = arith.constant dense<0.000000e+00> : vector<8xf32>
    %8 = vector.multi_reduction <add>, %2, %cst [1] : vector<8x32xf32> to vector<8xf32>
    %9 = vector.shape_cast %8 : vector<8xf32> to vector<8x1xf32>
    %cst_9 = arith.constant 3.200000e+01 : f32
    %10 = vector.broadcast %cst_9 : f32 to vector<8x1xf32>
    %11 = arith.divf %9, %10 : vector<8x1xf32>
    %12 = vector.broadcast %11 : vector<8x1xf32> to vector<8x32xf32>
    %13 = arith.subf %2, %12 : vector<8x32xf32>
    %14 = arith.mulf %13, %13 : vector<8x32xf32>
    %cst_10 = arith.constant dense<0.000000e+00> : vector<8xf32>
    %15 = vector.multi_reduction <add>, %14, %cst_10 [1] : vector<8x32xf32> to vector<8xf32>
    %16 = vector.shape_cast %15 : vector<8xf32> to vector<8x1xf32>
    %cst_11 = arith.constant 3.200000e+01 : f32
    %17 = vector.broadcast %cst_11 : f32 to vector<8x1xf32>
    %18 = arith.divf %16, %17 : vector<8x1xf32>
    %cst_12 = arith.constant 9.99999974E-6 : f32
    %19 = vector.broadcast %cst_12 : f32 to vector<8x1xf32>
    %20 = arith.addf %18, %19 : vector<8x1xf32>
    %21 = math.rsqrt %20 : vector<8x1xf32>
    %22 = vector.broadcast %21 : vector<8x1xf32> to vector<8x32xf32>
    %23 = arith.mulf %13, %22 : vector<8x32xf32>
    %24 = vector.broadcast %6 : vector<1x32xf32> to vector<8x32xf32>
    %25 = arith.mulf %23, %24 : vector<8x32xf32>
    %26 = vector.broadcast %7 : vector<1x32xf32> to vector<8x32xf32>
    %27 = arith.addf %25, %26 : vector<8x32xf32>
    %28 = arith.truncf %27 : vector<8x32xf32> to vector<8x32xbf16>
    %c0_13 = arith.constant 0 : index
    %c0_14 = arith.constant 0 : index
    %29 = vector.load %arg7[%c0_13, %c0_14] : memref<1x32xf32, #tpu.memory_space<vmem>>, vector<1x32xf32>
    %c0_15 = arith.constant 0 : index
    %c0_16 = arith.constant 0 : index
    %30 = vector.load %arg8[%c0_15, %c0_16] : memref<1x32xf32, #tpu.memory_space<vmem>>, vector<1x32xf32>
    %cst_17 = arith.constant dense<0.000000e+00> : vector<8xf32>
    %31 = vector.multi_reduction <add>, %5, %cst_17 [1] : vector<8x32xf32> to vector<8xf32>
    %32 = vector.shape_cast %31 : vector<8xf32> to vector<8x1xf32>
    %cst_18 = arith.constant 3.200000e+01 : f32
    %33 = vector.broadcast %cst_18 : f32 to vector<8x1xf32>
    %34 = arith.divf %32, %33 : vector<8x1xf32>
    %35 = vector.broadcast %34 : vector<8x1xf32> to vector<8x32xf32>
    %36 = arith.subf %5, %35 : vector<8x32xf32>
    %37 = arith.mulf %36, %36 : vector<8x32xf32>
    %cst_19 = arith.constant dense<0.000000e+00> : vector<8xf32>
    %38 = vector.multi_reduction <add>, %37, %cst_19 [1] : vector<8x32xf32> to vector<8xf32>
    %39 = vector.shape_cast %38 : vector<8xf32> to vector<8x1xf32>
    %cst_20 = arith.constant 3.200000e+01 : f32
    %40 = vector.broadcast %cst_20 : f32 to vector<8x1xf32>
    %41 = arith.divf %39, %40 : vector<8x1xf32>
    %cst_21 = arith.constant 9.99999974E-6 : f32
    %42 = vector.broadcast %cst_21 : f32 to vector<8x1xf32>
    %43 = arith.addf %41, %42 : vector<8x1xf32>
    %44 = math.rsqrt %43 : vector<8x1xf32>
    %45 = vector.broadcast %44 : vector<8x1xf32> to vector<8x32xf32>
    %46 = arith.mulf %36, %45 : vector<8x32xf32>
    %47 = vector.broadcast %29 : vector<1x32xf32> to vector<8x32xf32>
    %48 = arith.mulf %46, %47 : vector<8x32xf32>
    %49 = vector.broadcast %30 : vector<1x32xf32> to vector<8x32xf32>
    %50 = arith.addf %48, %49 : vector<8x32xf32>
    %51 = arith.truncf %50 : vector<8x32xf32> to vector<8x32xbf16>
    %c0_22 = arith.constant 0 : index
    %c0_23 = arith.constant 0 : index
    %52 = vector.load %arg3[%c0_22, %c0_23] : memref<32x96xbf16, #tpu.memory_space<vmem>>, vector<32x96xbf16>
    %cst_24 = arith.constant dense<0.000000e+00> : vector<8x96xf32>
    %53 = tpu.matmul %51, %52, %cst_24 {dimension_numbers = #tpu.dot_dimension_numbers<[1], [0], [0], [1], [0, 0, 1, 1], [], []>} : vector<8x32xbf16>, vector<32x96xbf16>, vector<8x96xf32> -> vector<8x96xf32>
    %c0_25 = arith.constant 0 : index
    %c0_26 = arith.constant 0 : index
    %54 = vector.load %arg4[%c0_25, %c0_26] : memref<32x64xbf16, #tpu.memory_space<vmem>>, vector<32x64xbf16>
    %cst_27 = arith.constant dense<0.000000e+00> : vector<8x64xf32>
    %55 = tpu.matmul %28, %54, %cst_27 {dimension_numbers = #tpu.dot_dimension_numbers<[1], [0], [0], [1], [0, 0, 1, 1], [], []>} : vector<8x32xbf16>, vector<32x64xbf16>, vector<8x64xf32> -> vector<8x64xf32>
    %56 = vector.extract_strided_slice %53 {offsets = [0, 0], sizes = [8, 32], strides = [1, 1]} : vector<8x96xf32> to vector<8x32xf32>
    %57 = arith.truncf %56 : vector<8x32xf32> to vector<8x32xbf16>
    %58 = vector.shape_cast %57 : vector<8x32xbf16> to vector<1x8x32xbf16>
    %59 = vector.extract_strided_slice %53 {offsets = [0, 32], sizes = [8, 32], strides = [1, 1]} : vector<8x96xf32> to vector<8x32xf32>
    %60 = arith.truncf %59 : vector<8x32xf32> to vector<8x32xbf16>
    %61 = vector.shape_cast %60 : vector<8x32xbf16> to vector<1x8x32xbf16>
    %62 = vector.extract_strided_slice %53 {offsets = [0, 64], sizes = [8, 32], strides = [1, 1]} : vector<8x96xf32> to vector<8x32xf32>
    %63 = arith.truncf %62 : vector<8x32xf32> to vector<8x32xbf16>
    %64 = vector.shape_cast %63 : vector<8x32xbf16> to vector<1x8x32xbf16>
    %65 = vector.extract_strided_slice %55 {offsets = [0, 0], sizes = [8, 32], strides = [1, 1]} : vector<8x64xf32> to vector<8x32xf32>
    %66 = arith.truncf %65 : vector<8x32xf32> to vector<8x32xbf16>
    %67 = vector.shape_cast %66 : vector<8x32xbf16> to vector<1x8x32xbf16>
    %68 = vector.extract_strided_slice %55 {offsets = [0, 32], sizes = [8, 32], strides = [1, 1]} : vector<8x64xf32> to vector<8x32xf32>
    %69 = arith.truncf %68 : vector<8x32xf32> to vector<8x32xbf16>
    %70 = vector.shape_cast %69 : vector<8x32xbf16> to vector<1x8x32xbf16>
    %71 = tpu.concatenate %67, %61 in 1 : vector<1x8x32xbf16>, vector<1x8x32xbf16> -> vector<1x16x32xbf16>
    %72 = tpu.concatenate %70, %64 in 1 : vector<1x8x32xbf16>, vector<1x8x32xbf16> -> vector<1x16x32xbf16>
    %73 = vector.extract_strided_slice %58 {offsets = [0, 0, 0], sizes = [1, 8, 8], strides = [1, 1, 1]} : vector<1x8x32xbf16> to vector<1x8x8xbf16>
    %74 = vector.extract_strided_slice %71 {offsets = [0, 0, 0], sizes = [1, 16, 8], strides = [1, 1, 1]} : vector<1x16x32xbf16> to vector<1x16x8xbf16>
    "tpu.trace_start"() <{level = 10 : i32, message = "bqd,bkd->bqk"}> : () -> ()
    %cst_28 = arith.constant dense<0.000000e+00> : vector<1x8x16xf32>
    %75 = tpu.matmul %73, %74, %cst_28 {dimension_numbers = #tpu.dot_dimension_numbers<[2], [2], [1], [1], [0, 0, 0, 1, 1, 1], [0], [0]>} : vector<1x8x8xbf16>, vector<1x16x8xbf16>, vector<1x8x16xf32> -> vector<1x8x16xf32>
    "tpu.trace_stop"() : () -> ()
    %cst_29 = arith.constant dense<0xFF800000> : vector<1x8xf32>
    %76 = vector.multi_reduction <maximumf>, %75, %cst_29 [2] : vector<1x8x16xf32> to vector<1x8xf32>
    %77 = vector.shape_cast %76 : vector<1x8xf32> to vector<1x8x1xf32>
    %78 = vector.broadcast %77 : vector<1x8x1xf32> to vector<1x8x16xf32>
    %79 = arith.subf %75, %78 : vector<1x8x16xf32>
    %80 = math.exp %79 : vector<1x8x16xf32>
    %cst_30 = arith.constant dense<0.000000e+00> : vector<1x8xf32>
    %81 = vector.multi_reduction <add>, %80, %cst_30 [2] : vector<1x8x16xf32> to vector<1x8xf32>
    %82 = vector.shape_cast %81 : vector<1x8xf32> to vector<1x8x1xf32>
    %83 = tpu.reciprocal %82 {approx = true} : vector<1x8x1xf32> -> vector<1x8x1xf32>
    %84 = vector.broadcast %83 : vector<1x8x1xf32> to vector<1x8x16xf32>
    %85 = arith.mulf %80, %84 : vector<1x8x16xf32>
    %86 = arith.truncf %85 : vector<1x8x16xf32> to vector<1x8x16xbf16>
    %87 = vector.extract_strided_slice %72 {offsets = [0, 0, 0], sizes = [1, 16, 8], strides = [1, 1, 1]} : vector<1x16x32xbf16> to vector<1x16x8xbf16>
    "tpu.trace_start"() <{level = 10 : i32, message = "bqk,bkd->bqd"}> : () -> ()
    %cst_31 = arith.constant dense<0.000000e+00> : vector<1x8x8xf32>
    %88 = tpu.matmul %86, %87, %cst_31 {dimension_numbers = #tpu.dot_dimension_numbers<[2], [1], [1], [2], [0, 0, 0, 1, 1, 2], [0], [0]>} : vector<1x8x16xbf16>, vector<1x16x8xbf16>, vector<1x8x8xf32> -> vector<1x8x8xf32>
    "tpu.trace_stop"() : () -> ()
    %89 = vector.extract_strided_slice %58 {offsets = [0, 0, 8], sizes = [1, 8, 8], strides = [1, 1, 1]} : vector<1x8x32xbf16> to vector<1x8x8xbf16>
    %90 = vector.extract_strided_slice %71 {offsets = [0, 0, 8], sizes = [1, 16, 8], strides = [1, 1, 1]} : vector<1x16x32xbf16> to vector<1x16x8xbf16>
    "tpu.trace_start"() <{level = 10 : i32, message = "bqd,bkd->bqk"}> : () -> ()
    %cst_32 = arith.constant dense<0.000000e+00> : vector<1x8x16xf32>
    %91 = tpu.matmul %89, %90, %cst_32 {dimension_numbers = #tpu.dot_dimension_numbers<[2], [2], [1], [1], [0, 0, 0, 1, 1, 1], [0], [0]>} : vector<1x8x8xbf16>, vector<1x16x8xbf16>, vector<1x8x16xf32> -> vector<1x8x16xf32>
    "tpu.trace_stop"() : () -> ()
    %cst_33 = arith.constant dense<0xFF800000> : vector<1x8xf32>
    %92 = vector.multi_reduction <maximumf>, %91, %cst_33 [2] : vector<1x8x16xf32> to vector<1x8xf32>
    %93 = vector.shape_cast %92 : vector<1x8xf32> to vector<1x8x1xf32>
    %94 = vector.broadcast %93 : vector<1x8x1xf32> to vector<1x8x16xf32>
    %95 = arith.subf %91, %94 : vector<1x8x16xf32>
    %96 = math.exp %95 : vector<1x8x16xf32>
    %cst_34 = arith.constant dense<0.000000e+00> : vector<1x8xf32>
    %97 = vector.multi_reduction <add>, %96, %cst_34 [2] : vector<1x8x16xf32> to vector<1x8xf32>
    %98 = vector.shape_cast %97 : vector<1x8xf32> to vector<1x8x1xf32>
    %99 = tpu.reciprocal %98 {approx = true} : vector<1x8x1xf32> -> vector<1x8x1xf32>
    %100 = vector.broadcast %99 : vector<1x8x1xf32> to vector<1x8x16xf32>
    %101 = arith.mulf %96, %100 : vector<1x8x16xf32>
    %102 = arith.truncf %101 : vector<1x8x16xf32> to vector<1x8x16xbf16>
    %103 = vector.extract_strided_slice %72 {offsets = [0, 0, 8], sizes = [1, 16, 8], strides = [1, 1, 1]} : vector<1x16x32xbf16> to vector<1x16x8xbf16>
    "tpu.trace_start"() <{level = 10 : i32, message = "bqk,bkd->bqd"}> : () -> ()
    %cst_35 = arith.constant dense<0.000000e+00> : vector<1x8x8xf32>
    %104 = tpu.matmul %102, %103, %cst_35 {dimension_numbers = #tpu.dot_dimension_numbers<[2], [1], [1], [2], [0, 0, 0, 1, 1, 2], [0], [0]>} : vector<1x8x16xbf16>, vector<1x16x8xbf16>, vector<1x8x8xf32> -> vector<1x8x8xf32>
    "tpu.trace_stop"() : () -> ()
    %105 = vector.extract_strided_slice %58 {offsets = [0, 0, 16], sizes = [1, 8, 8], strides = [1, 1, 1]} : vector<1x8x32xbf16> to vector<1x8x8xbf16>
    %106 = vector.extract_strided_slice %71 {offsets = [0, 0, 16], sizes = [1, 16, 8], strides = [1, 1, 1]} : vector<1x16x32xbf16> to vector<1x16x8xbf16>
    "tpu.trace_start"() <{level = 10 : i32, message = "bqd,bkd->bqk"}> : () -> ()
    %cst_36 = arith.constant dense<0.000000e+00> : vector<1x8x16xf32>
    %107 = tpu.matmul %105, %106, %cst_36 {dimension_numbers = #tpu.dot_dimension_numbers<[2], [2], [1], [1], [0, 0, 0, 1, 1, 1], [0], [0]>} : vector<1x8x8xbf16>, vector<1x16x8xbf16>, vector<1x8x16xf32> -> vector<1x8x16xf32>
    "tpu.trace_stop"() : () -> ()
    %cst_37 = arith.constant dense<0xFF800000> : vector<1x8xf32>
    %108 = vector.multi_reduction <maximumf>, %107, %cst_37 [2] : vector<1x8x16xf32> to vector<1x8xf32>
    %109 = vector.shape_cast %108 : vector<1x8xf32> to vector<1x8x1xf32>
    %110 = vector.broadcast %109 : vector<1x8x1xf32> to vector<1x8x16xf32>
    %111 = arith.subf %107, %110 : vector<1x8x16xf32>
    %112 = math.exp %111 : vector<1x8x16xf32>
    %cst_38 = arith.constant dense<0.000000e+00> : vector<1x8xf32>
    %113 = vector.multi_reduction <add>, %112, %cst_38 [2] : vector<1x8x16xf32> to vector<1x8xf32>
    %114 = vector.shape_cast %113 : vector<1x8xf32> to vector<1x8x1xf32>
    %115 = tpu.reciprocal %114 {approx = true} : vector<1x8x1xf32> -> vector<1x8x1xf32>
    %116 = vector.broadcast %115 : vector<1x8x1xf32> to vector<1x8x16xf32>
    %117 = arith.mulf %112, %116 : vector<1x8x16xf32>
    %118 = arith.truncf %117 : vector<1x8x16xf32> to vector<1x8x16xbf16>
    %119 = vector.extract_strided_slice %72 {offsets = [0, 0, 16], sizes = [1, 16, 8], strides = [1, 1, 1]} : vector<1x16x32xbf16> to vector<1x16x8xbf16>
    "tpu.trace_start"() <{level = 10 : i32, message = "bqk,bkd->bqd"}> : () -> ()
    %cst_39 = arith.constant dense<0.000000e+00> : vector<1x8x8xf32>
    %120 = tpu.matmul %118, %119, %cst_39 {dimension_numbers = #tpu.dot_dimension_numbers<[2], [1], [1], [2], [0, 0, 0, 1, 1, 2], [0], [0]>} : vector<1x8x16xbf16>, vector<1x16x8xbf16>, vector<1x8x8xf32> -> vector<1x8x8xf32>
    "tpu.trace_stop"() : () -> ()
    %121 = vector.extract_strided_slice %58 {offsets = [0, 0, 24], sizes = [1, 8, 8], strides = [1, 1, 1]} : vector<1x8x32xbf16> to vector<1x8x8xbf16>
    %122 = vector.extract_strided_slice %71 {offsets = [0, 0, 24], sizes = [1, 16, 8], strides = [1, 1, 1]} : vector<1x16x32xbf16> to vector<1x16x8xbf16>
    "tpu.trace_start"() <{level = 10 : i32, message = "bqd,bkd->bqk"}> : () -> ()
    %cst_40 = arith.constant dense<0.000000e+00> : vector<1x8x16xf32>
    %123 = tpu.matmul %121, %122, %cst_40 {dimension_numbers = #tpu.dot_dimension_numbers<[2], [2], [1], [1], [0, 0, 0, 1, 1, 1], [0], [0]>} : vector<1x8x8xbf16>, vector<1x16x8xbf16>, vector<1x8x16xf32> -> vector<1x8x16xf32>
    "tpu.trace_stop"() : () -> ()
    %cst_41 = arith.constant dense<0xFF800000> : vector<1x8xf32>
    %124 = vector.multi_reduction <maximumf>, %123, %cst_41 [2] : vector<1x8x16xf32> to vector<1x8xf32>
    %125 = vector.shape_cast %124 : vector<1x8xf32> to vector<1x8x1xf32>
    %126 = vector.broadcast %125 : vector<1x8x1xf32> to vector<1x8x16xf32>
    %127 = arith.subf %123, %126 : vector<1x8x16xf32>
    %128 = math.exp %127 : vector<1x8x16xf32>
    %cst_42 = arith.constant dense<0.000000e+00> : vector<1x8xf32>
    %129 = vector.multi_reduction <add>, %128, %cst_42 [2] : vector<1x8x16xf32> to vector<1x8xf32>
    %130 = vector.shape_cast %129 : vector<1x8xf32> to vector<1x8x1xf32>
    %131 = tpu.reciprocal %130 {approx = true} : vector<1x8x1xf32> -> vector<1x8x1xf32>
    %132 = vector.broadcast %131 : vector<1x8x1xf32> to vector<1x8x16xf32>
    %133 = arith.mulf %128, %132 : vector<1x8x16xf32>
    %134 = arith.truncf %133 : vector<1x8x16xf32> to vector<1x8x16xbf16>
    %135 = vector.extract_strided_slice %72 {offsets = [0, 0, 24], sizes = [1, 16, 8], strides = [1, 1, 1]} : vector<1x16x32xbf16> to vector<1x16x8xbf16>
    "tpu.trace_start"() <{level = 10 : i32, message = "bqk,bkd->bqd"}> : () -> ()
    %cst_43 = arith.constant dense<0.000000e+00> : vector<1x8x8xf32>
    %136 = tpu.matmul %134, %135, %cst_43 {dimension_numbers = #tpu.dot_dimension_numbers<[2], [1], [1], [2], [0, 0, 0, 1, 1, 2], [0], [0]>} : vector<1x8x16xbf16>, vector<1x16x8xbf16>, vector<1x8x8xf32> -> vector<1x8x8xf32>
    "tpu.trace_stop"() : () -> ()
    %137 = tpu.concatenate %88, %104, %120, %136 in 2 : vector<1x8x8xf32>, vector<1x8x8xf32>, vector<1x8x8xf32>, vector<1x8x8xf32> -> vector<1x8x32xf32>
    %c0_44 = arith.constant 0 : index
    %c0_45 = arith.constant 0 : index
    %c0_46 = arith.constant 0 : index
    %138 = vector.load %arg9[%c0_44, %c0_45, %c0_46] : memref<1x8x32xf32, #tpu.memory_space<vmem>>, vector<1x8x32xf32>
    tpu.vector_store %arg9[%c0_44, %c0_45, %c0_46], %137 {strides = array<i32>} : memref<1x8x32xf32, #tpu.memory_space<vmem>>, vector<1x8x32xf32>,
    return
  }
  func.func @transform_0(%arg0: i32) -> (i32, i32, i32) {
    %c0_i32 = arith.constant 0 : i32
    %c0_i32_0 = arith.constant 0 : i32
    %c0_i32_1 = arith.constant 0 : i32
    return %arg0, %c0_i32, %c0_i32_0 : i32, i32, i32
  }
  func.func @transform_1(%arg0: i32) -> (i32, i32, i32) {
    %c0_i32 = arith.constant 0 : i32
    %c0_i32_0 = arith.constant 0 : i32
    %c0_i32_1 = arith.constant 0 : i32
    return %arg0, %c0_i32, %c0_i32_0 : i32, i32, i32
  }
  func.func @transform_2(%arg0: i32) -> (i32, i32) {
    %c0_i32 = arith.constant 0 : i32
    %c0_i32_0 = arith.constant 0 : i32
    %c0_i32_1 = arith.constant 0 : i32
    return %c0_i32, %c0_i32_0 : i32, i32
  }
  func.func @transform_3(%arg0: i32) -> (i32, i32) {
    %c0_i32 = arith.constant 0 : i32
    %c0_i32_0 = arith.constant 0 : i32
    %c0_i32_1 = arith.constant 0 : i32
    return %c0_i32, %c0_i32_0 : i32, i32
  }
  func.func @transform_4(%arg0: i32) -> (i32, i32) {
    %c0_i32 = arith.constant 0 : i32
    %c0_i32_0 = arith.constant 0 : i32
    %c0_i32_1 = arith.constant 0 : i32
    return %c0_i32, %c0_i32_0 : i32, i32
  }
  func.func @transform_5(%arg0: i32) -> (i32, i32) {
    %c0_i32 = arith.constant 0 : i32
    %c0_i32_0 = arith.constant 0 : i32
    %c0_i32_1 = arith.constant 0 : i32
    return %c0_i32, %c0_i32_0 : i32, i32
  }
  func.func @transform_6(%arg0: i32) -> (i32, i32) {
    %c0_i32 = arith.constant 0 : i32
    %c0_i32_0 = arith.constant 0 : i32
    %c0_i32_1 = arith.constant 0 : i32
    return %c0_i32, %c0_i32_0 : i32, i32
  }
  func.func @transform_7(%arg0: i32) -> (i32, i32) {
    %c0_i32 = arith.constant 0 : i32
    %c0_i32_0 = arith.constant 0 : i32
    %c0_i32_1 = arith.constant 0 : i32
    return %c0_i32, %c0_i32_0 : i32, i32
  }
  func.func @transform_8(%arg0: i32) -> (i32, i32, i32) {
    %c0_i32 = arith.constant 0 : i32
    %c0_i32_0 = arith.constant 0 : i32
    %c0_i32_1 = arith.constant 0 : i32
    return %arg0, %c0_i32, %c0_i32_0 : i32, i32, i32
  }
}

module attributes {stable_mosaic.version = 11 : i64} {
  func.func @kernel(%arg0: i32, %arg1: memref<1x8x32xbf16, #tpu.memory_space<vmem>>, %arg2: memref<1x8x32xbf16, #tpu.memory_space<vmem>>, %arg3: memref<32x96xbf16, #tpu.memory_space<vmem>>, %arg4: memref<32x64xbf16, #tpu.memory_space<vmem>>, %arg5: memref<1x32xf32, #tpu.memory_space<vmem>>, %arg6: memref<1x32xf32, #tpu.memory_space<vmem>>, %arg7: memref<1x32xf32, #tpu.memory_space<vmem>>, %arg8: memref<1x32xf32, #tpu.memory_space<vmem>>, %arg9: memref<1x8x32xf32, #tpu.memory_space<vmem>>) attributes {dimension_semantics = [#tpu.dimension_semantics<parallel>], iteration_bounds = array<i64: 2>, scalar_prefetch = 0 : i64, scratch_operands = 0 : i64, tpu.core_type = #tpu.core_type<tc>, window_params = [{transform_indices = @transform_0, window_bounds = array<i64: 1, 8, 32>}, {transform_indices = @transform_1, window_bounds = array<i64: 1, 8, 32>}, {pipeline_mode = #tpu.pipeline_mode<synchronous>, transform_indices = @transform_2, window_bounds = array<i64: 32, 96>}, {pipeline_mode = #tpu.pipeline_mode<synchronous>, transform_indices = @transform_3, window_bounds = array<i64: 32, 64>}, {pipeline_mode = #tpu.pipeline_mode<synchronous>, transform_indices = @transform_4, window_bounds = array<i64: 1, 32>}, {pipeline_mode = #tpu.pipeline_mode<synchronous>, transform_indices = @transform_5, window_bounds = array<i64: 1, 32>}, {pipeline_mode = #tpu.pipeline_mode<synchronous>, transform_indices = @transform_6, window_bounds = array<i64: 1, 32>}, {pipeline_mode = #tpu.pipeline_mode<synchronous>, transform_indices = @transform_7, window_bounds = array<i64: 1, 32>}, {transform_indices = @transform_8, window_bounds = array<i64: 1, 8, 32>}]} {
    %c0 = arith.constant 0 : index
    %c0_0 = arith.constant 0 : index
    %c0_1 = arith.constant 0 : index
    %0 = vector.load %arg1[%c0, %c0_0, %c0_1] : memref<1x8x32xbf16, #tpu.memory_space<vmem>>, vector<1x8x32xbf16>
    %1 = arith.extf %0 : vector<1x8x32xbf16> to vector<1x8x32xf32>
    %2 = vector.shape_cast %1 : vector<1x8x32xf32> to vector<8x32xf32>
    %c0_2 = arith.constant 0 : index
    %c0_3 = arith.constant 0 : index
    %c0_4 = arith.constant 0 : index
    %3 = vector.load %arg2[%c0_2, %c0_3, %c0_4] : memref<1x8x32xbf16, #tpu.memory_space<vmem>>, vector<1x8x32xbf16>
    %4 = arith.extf %3 : vector<1x8x32xbf16> to vector<1x8x32xf32>
    %5 = vector.shape_cast %4 : vector<1x8x32xf32> to vector<8x32xf32>
    %c0_5 = arith.constant 0 : index
    %c0_6 = arith.constant 0 : index
    %6 = vector.load %arg5[%c0_5, %c0_6] : memref<1x32xf32, #tpu.memory_space<vmem>>, vector<1x32xf32>
    %c0_7 = arith.constant 0 : index
    %c0_8 = arith.constant 0 : index
    %7 = vector.load %arg6[%c0_7, %c0_8] : memref<1x32xf32, #tpu.memory_space<vmem>>, vector<1x32xf32>
    %cst = arith.constant dense<0.000000e+00> : vector<8xf32>
    %8 = vector.multi_reduction <add>, %2, %cst [1] : vector<8x32xf32> to vector<8xf32>
    %9 = vector.shape_cast %8 : vector<8xf32> to vector<8x1xf32>
    %cst_9 = arith.constant 3.200000e+01 : f32
    %10 = vector.broadcast %cst_9 : f32 to vector<8x1xf32>
    %11 = arith.divf %9, %10 : vector<8x1xf32>
    %12 = vector.broadcast %11 : vector<8x1xf32> to vector<8x32xf32>
    %13 = arith.subf %2, %12 : vector<8x32xf32>
    %14 = arith.mulf %13, %13 : vector<8x32xf32>
    %cst_10 = arith.constant dense<0.000000e+00> : vector<8xf32>
    %15 = vector.multi_reduction <add>, %14, %cst_10 [1] : vector<8x32xf32> to vector<8xf32>
    %16 = vector.shape_cast %15 : vector<8xf32> to vector<8x1xf32>
    %cst_11 = arith.constant 3.200000e+01 : f32
    %17 = vector.broadcast %cst_11 : f32 to vector<8x1xf32>
    %18 = arith.divf %16, %17 : vector<8x1xf32>
    %cst_12 = arith.constant 9.99999974E-6 : f32
    %19 = vector.broadcast %cst_12 : f32 to vector<8x1xf32>
    %20 = arith.addf %18, %19 : vector<8x1xf32>
    %21 = math.rsqrt %20 : vector<8x1xf32>
    %22 = vector.broadcast %21 : vector<8x1xf32> to vector<8x32xf32>
    %23 = arith.mulf %13, %22 : vector<8x32xf32>
    %24 = vector.broadcast %6 : vector<1x32xf32> to vector<8x32xf32>
    %25 = arith.mulf %23, %24 : vector<8x32xf32>
    %26 = vector.broadcast %7 : vector<1x32xf32> to vector<8x32xf32>
    %27 = arith.addf %25, %26 : vector<8x32xf32>
    %28 = arith.truncf %27 : vector<8x32xf32> to vector<8x32xbf16>
    %c0_13 = arith.constant 0 : index
    %c0_14 = arith.constant 0 : index
    %29 = vector.load %arg7[%c0_13, %c0_14] : memref<1x32xf32, #tpu.memory_space<vmem>>, vector<1x32xf32>
    %c0_15 = arith.constant 0 : index
    %c0_16 = arith.constant 0 : index
    %30 = vector.load %arg8[%c0_15, %c0_16] : memref<1x32xf32, #tpu.memory_space<vmem>>, vector<1x32xf32>
    %cst_17 = arith.constant dense<0.000000e+00> : vector<8xf32>
    %31 = vector.multi_reduction <add>, %5, %cst_17 [1] : vector<8x32xf32> to vector<8xf32>
    %32 = vector.shape_cast %31 : vector<8xf32> to vector<8x1xf32>
    %cst_18 = arith.constant 3.200000e+01 : f32
    %33 = vector.broadcast %cst_18 : f32 to vector<8x1xf32>
    %34 = arith.divf %32, %33 : vector<8x1xf32>
    %35 = vector.broadcast %34 : vector<8x1xf32> to vector<8x32xf32>
    %36 = arith.subf %5, %35 : vector<8x32xf32>
    %37 = arith.mulf %36, %36 : vector<8x32xf32>
    %cst_19 = arith.constant dense<0.000000e+00> : vector<8xf32>
    %38 = vector.multi_reduction <add>, %37, %cst_19 [1] : vector<8x32xf32> to vector<8xf32>
    %39 = vector.shape_cast %38 : vector<8xf32> to vector<8x1xf32>
    %cst_20 = arith.constant 3.200000e+01 : f32
    %40 = vector.broadcast %cst_20 : f32 to vector<8x1xf32>
    %41 = arith.divf %39, %40 : vector<8x1xf32>
    %cst_21 = arith.constant 9.99999974E-6 : f32
    %42 = vector.broadcast %cst_21 : f32 to vector<8x1xf32>
    %43 = arith.addf %41, %42 : vector<8x1xf32>
    %44 = math.rsqrt %43 : vector<8x1xf32>
    %45 = vector.broadcast %44 : vector<8x1xf32> to vector<8x32xf32>
    %46 = arith.mulf %36, %45 : vector<8x32xf32>
    %47 = vector.broadcast %29 : vector<1x32xf32> to vector<8x32xf32>
    %48 = arith.mulf %46, %47 : vector<8x32xf32>
    %49 = vector.broadcast %30 : vector<1x32xf32> to vector<8x32xf32>
    %50 = arith.addf %48, %49 : vector<8x32xf32>
    %51 = arith.truncf %50 : vector<8x32xf32> to vector<8x32xbf16>
    %c0_22 = arith.constant 0 : index
    %c0_23 = arith.constant 0 : index
    %52 = vector.load %arg3[%c0_22, %c0_23] : memref<32x96xbf16, #tpu.memory_space<vmem>>, vector<32x96xbf16>
    %cst_24 = arith.constant dense<0.000000e+00> : vector<8x96xf32>
    %53 = tpu.matmul %51, %52, %cst_24 {dimension_numbers = #tpu.dot_dimension_numbers<[1], [0], [0], [1], [0, 0, 1, 1], [], []>} : vector<8x32xbf16>, vector<32x96xbf16>, vector<8x96xf32> -> vector<8x96xf32>
    %c0_25 = arith.constant 0 : index
    %c0_26 = arith.constant 0 : index
    %54 = vector.load %arg4[%c0_25, %c0_26] : memref<32x64xbf16, #tpu.memory_space<vmem>>, vector<32x64xbf16>
    %cst_27 = arith.constant dense<0.000000e+00> : vector<8x64xf32>
    %55 = tpu.matmul %28, %54, %cst_27 {dimension_numbers = #tpu.dot_dimension_numbers<[1], [0], [0], [1], [0, 0, 1, 1], [], []>} : vector<8x32xbf16>, vector<32x64xbf16>, vector<8x64xf32> -> vector<8x64xf32>
    %56 = vector.extract_strided_slice %53 {offsets = [0, 0], sizes = [8, 32], strides = [1, 1]} : vector<8x96xf32> to vector<8x32xf32>
    %57 = arith.truncf %56 : vector<8x32xf32> to vector<8x32xbf16>
    %58 = vector.shape_cast %57 : vector<8x32xbf16> to vector<1x8x32xbf16>
    %59 = vector.extract_strided_slice %53 {offsets = [0, 32], sizes = [8, 32], strides = [1, 1]} : vector<8x96xf32> to vector<8x32xf32>
    %60 = arith.truncf %59 : vector<8x32xf32> to vector<8x32xbf16>
    %61 = vector.shape_cast %60 : vector<8x32xbf16> to vector<1x8x32xbf16>
    %62 = vector.extract_strided_slice %53 {offsets = [0, 64], sizes = [8, 32], strides = [1, 1]} : vector<8x96xf32> to vector<8x32xf32>
    %63 = arith.truncf %62 : vector<8x32xf32> to vector<8x32xbf16>
    %64 = vector.shape_cast %63 : vector<8x32xbf16> to vector<1x8x32xbf16>
    %65 = vector.extract_strided_slice %55 {offsets = [0, 0], sizes = [8, 32], strides = [1, 1]} : vector<8x64xf32> to vector<8x32xf32>
    %66 = arith.truncf %65 : vector<8x32xf32> to vector<8x32xbf16>
    %67 = vector.shape_cast %66 : vector<8x32xbf16> to vector<1x8x32xbf16>
    %68 = vector.extract_strided_slice %55 {offsets = [0, 32], sizes = [8, 32], strides = [1, 1]} : vector<8x64xf32> to vector<8x32xf32>
    %69 = arith.truncf %68 : vector<8x32xf32> to vector<8x32xbf16>
    %70 = vector.shape_cast %69 : vector<8x32xbf16> to vector<1x8x32xbf16>
    %71 = tpu.concatenate %67, %61 in 1 : vector<1x8x32xbf16>, vector<1x8x32xbf16> -> vector<1x16x32xbf16>
    %72 = tpu.concatenate %70, %64 in 1 : vector<1x8x32xbf16>, vector<1x8x32xbf16> -> vector<1x16x32xbf16>
    %73 = vector.extract_strided_slice %58 {offsets = [0, 0, 0], sizes = [1, 8, 8], strides = [1, 1, 1]} : vector<1x8x32xbf16> to vector<1x8x8xbf16>
    %74 = vector.extract_strided_slice %71 {offsets = [0, 0, 0], sizes = [1, 16, 8], strides = [1, 1, 1]} : vector<1x16x32xbf16> to vector<1x16x8xbf16>
    "tpu.trace_start"() <{level = 10 : i32, message = "bqd,bkd->bqk"}> : () -> ()
    %cst_28 = arith.constant dense<0.000000e+00> : vector<1x8x16xf32>
    %75 = tpu.matmul %73, %74, %cst_28 {dimension_numbers = #tpu.dot_dimension_numbers<[2], [2], [1], [1], [0, 0, 0, 1, 1, 1], [0], [0]>} : vector<1x8x8xbf16>, vector<1x16x8xbf16>, vector<1x8x16xf32> -> vector<1x8x16xf32>
    "tpu.trace_stop"() : () -> ()
    %cst_29 = arith.constant dense<0xFF800000> : vector<1x8xf32>
    %76 = vector.multi_reduction <maximumf>, %75, %cst_29 [2] : vector<1x8x16xf32> to vector<1x8xf32>
    %77 = vector.shape_cast %76 : vector<1x8xf32> to vector<1x8x1xf32>
    %78 = vector.broadcast %77 : vector<1x8x1xf32> to vector<1x8x16xf32>
    %79 = arith.subf %75, %78 : vector<1x8x16xf32>
    %80 = math.exp %79 : vector<1x8x16xf32>
    %cst_30 = arith.constant dense<0.000000e+00> : vector<1x8xf32>
    %81 = vector.multi_reduction <add>, %80, %cst_30 [2] : vector<1x8x16xf32> to vector<1x8xf32>
    %82 = vector.shape_cast %81 : vector<1x8xf32> to vector<1x8x1xf32>
    %83 = tpu.reciprocal %82 {approx = true} : vector<1x8x1xf32> -> vector<1x8x1xf32>
    %84 = vector.broadcast %83 : vector<1x8x1xf32> to vector<1x8x16xf32>
    %85 = arith.mulf %80, %84 : vector<1x8x16xf32>
    %86 = arith.truncf %85 : vector<1x8x16xf32> to vector<1x8x16xbf16>
    %87 = vector.extract_strided_slice %72 {offsets = [0, 0, 0], sizes = [1, 16, 8], strides = [1, 1, 1]} : vector<1x16x32xbf16> to vector<1x16x8xbf16>
    "tpu.trace_start"() <{level = 10 : i32, message = "bqk,bkd->bqd"}> : () -> ()
    %cst_31 = arith.constant dense<0.000000e+00> : vector<1x8x8xf32>
    %88 = tpu.matmul %86, %87, %cst_31 {dimension_numbers = #tpu.dot_dimension_numbers<[2], [1], [1], [2], [0, 0, 0, 1, 1, 2], [0], [0]>} : vector<1x8x16xbf16>, vector<1x16x8xbf16>, vector<1x8x8xf32> -> vector<1x8x8xf32>
    "tpu.trace_stop"() : () -> ()
    %89 = vector.extract_strided_slice %58 {offsets = [0, 0, 8], sizes = [1, 8, 8], strides = [1, 1, 1]} : vector<1x8x32xbf16> to vector<1x8x8xbf16>
    %90 = vector.extract_strided_slice %71 {offsets = [0, 0, 8], sizes = [1, 16, 8], strides = [1, 1, 1]} : vector<1x16x32xbf16> to vector<1x16x8xbf16>
    "tpu.trace_start"() <{level = 10 : i32, message = "bqd,bkd->bqk"}> : () -> ()
    %cst_32 = arith.constant dense<0.000000e+00> : vector<1x8x16xf32>
    %91 = tpu.matmul %89, %90, %cst_32 {dimension_numbers = #tpu.dot_dimension_numbers<[2], [2], [1], [1], [0, 0, 0, 1, 1, 1], [0], [0]>} : vector<1x8x8xbf16>, vector<1x16x8xbf16>, vector<1x8x16xf32> -> vector<1x8x16xf32>
    "tpu.trace_stop"() : () -> ()
    %cst_33 = arith.constant dense<0xFF800000> : vector<1x8xf32>
    %92 = vector.multi_reduction <maximumf>, %91, %cst_33 [2] : vector<1x8x16xf32> to vector<1x8xf32>
    %93 = vector.shape_cast %92 : vector<1x8xf32> to vector<1x8x1xf32>
    %94 = vector.broadcast %93 : vector<1x8x1xf32> to vector<1x8x16xf32>
    %95 = arith.subf %91, %94 : vector<1x8x16xf32>
    %96 = math.exp %95 : vector<1x8x16xf32>
    %cst_34 = arith.constant dense<0.000000e+00> : vector<1x8xf32>
    %97 = vector.multi_reduction <add>, %96, %cst_34 [2] : vector<1x8x16xf32> to vector<1x8xf32>
    %98 = vector.shape_cast %97 : vector<1x8xf32> to vector<1x8x1xf32>
    %99 = tpu.reciprocal %98 {approx = true} : vector<1x8x1xf32> -> vector<1x8x1xf32>
    %100 = vector.broadcast %99 : vector<1x8x1xf32> to vector<1x8x16xf32>
    %101 = arith.mulf %96, %100 : vector<1x8x16xf32>
    %102 = arith.truncf %101 : vector<1x8x16xf32> to vector<1x8x16xbf16>
    %103 = vector.extract_strided_slice %72 {offsets = [0, 0, 8], sizes = [1, 16, 8], strides = [1, 1, 1]} : vector<1x16x32xbf16> to vector<1x16x8xbf16>
    "tpu.trace_start"() <{level = 10 : i32, message = "bqk,bkd->bqd"}> : () -> ()
    %cst_35 = arith.constant dense<0.000000e+00> : vector<1x8x8xf32>
    %104 = tpu.matmul %102, %103, %cst_35 {dimension_numbers = #tpu.dot_dimension_numbers<[2], [1], [1], [2], [0, 0, 0, 1, 1, 2], [0], [0]>} : vector<1x8x16xbf16>, vector<1x16x8xbf16>, vector<1x8x8xf32> -> vector<1x8x8xf32>
    "tpu.trace_stop"() : () -> ()
    %105 = vector.extract_strided_slice %58 {offsets = [0, 0, 16], sizes = [1, 8, 8], strides = [1, 1, 1]} : vector<1x8x32xbf16> to vector<1x8x8xbf16>
    %106 = vector.extract_strided_slice %71 {offsets = [0, 0, 16], sizes = [1, 16, 8], strides = [1, 1, 1]} : vector<1x16x32xbf16> to vector<1x16x8xbf16>
    "tpu.trace_start"() <{level = 10 : i32, message = "bqd,bkd->bqk"}> : () -> ()
    %cst_36 = arith.constant dense<0.000000e+00> : vector<1x8x16xf32>
    %107 = tpu.matmul %105, %106, %cst_36 {dimension_numbers = #tpu.dot_dimension_numbers<[2], [2], [1], [1], [0, 0, 0, 1, 1, 1], [0], [0]>} : vector<1x8x8xbf16>, vector<1x16x8xbf16>, vector<1x8x16xf32> -> vector<1x8x16xf32>
    "tpu.trace_stop"() : () -> ()
    %cst_37 = arith.constant dense<0xFF800000> : vector<1x8xf32>
    %108 = vector.multi_reduction <maximumf>, %107, %cst_37 [2] : vector<1x8x16xf32> to vector<1x8xf32>
    %109 = vector.shape_cast %108 : vector<1x8xf32> to vector<1x8x1xf32>
    %110 = vector.broadcast %109 : vector<1x8x1xf32> to vector<1x8x16xf32>
    %111 = arith.subf %107, %110 : vector<1x8x16xf32>
    %112 = math.exp %111 : vector<1x8x16xf32>
    %cst_38 = arith.constant dense<0.000000e+00> : vector<1x8xf32>
    %113 = vector.multi_reduction <add>, %112, %cst_38 [2] : vector<1x8x16xf32> to vector<1x8xf32>
    %114 = vector.shape_cast %113 : vector<1x8xf32> to vector<1x8x1xf32>
    %115 = tpu.reciprocal %114 {approx = true} : vector<1x8x1xf32> -> vector<1x8x1xf32>
    %116 = vector.broadcast %115 : vector<1x8x1xf32> to vector<1x8x16xf32>
    %117 = arith.mulf %112, %116 : vector<1x8x16xf32>
    %118 = arith.truncf %117 : vector<1x8x16xf32> to vector<1x8x16xbf16>
    %119 = vector.extract_strided_slice %72 {offsets = [0, 0, 16], sizes = [1, 16, 8], strides = [1, 1, 1]} : vector<1x16x32xbf16> to vector<1x16x8xbf16>
    "tpu.trace_start"() <{level = 10 : i32, message = "bqk,bkd->bqd"}> : () -> ()
    %cst_39 = arith.constant dense<0.000000e+00> : vector<1x8x8xf32>
    %120 = tpu.matmul %118, %119, %cst_39 {dimension_numbers = #tpu.dot_dimension_numbers<[2], [1], [1], [2], [0, 0, 0, 1, 1, 2], [0], [0]>} : vector<1x8x16xbf16>, vector<1x16x8xbf16>, vector<1x8x8xf32> -> vector<1x8x8xf32>
    "tpu.trace_stop"() : () -> ()
    %121 = vector.extract_strided_slice %58 {offsets = [0, 0, 24], sizes = [1, 8, 8], strides = [1, 1, 1]} : vector<1x8x32xbf16> to vector<1x8x8xbf16>
    %122 = vector.extract_strided_slice %71 {offsets = [0, 0, 24], sizes = [1, 16, 8], strides = [1, 1, 1]} : vector<1x16x32xbf16> to vector<1x16x8xbf16>
    "tpu.trace_start"() <{level = 10 : i32, message = "bqd,bkd->bqk"}> : () -> ()
    %cst_40 = arith.constant dense<0.000000e+00> : vector<1x8x16xf32>
    %123 = tpu.matmul %121, %122, %cst_40 {dimension_numbers = #tpu.dot_dimension_numbers<[2], [2], [1], [1], [0, 0, 0, 1, 1, 1], [0], [0]>} : vector<1x8x8xbf16>, vector<1x16x8xbf16>, vector<1x8x16xf32> -> vector<1x8x16xf32>
    "tpu.trace_stop"() : () -> ()
    %cst_41 = arith.constant dense<0xFF800000> : vector<1x8xf32>
    %124 = vector.multi_reduction <maximumf>, %123, %cst_41 [2] : vector<1x8x16xf32> to vector<1x8xf32>
    %125 = vector.shape_cast %124 : vector<1x8xf32> to vector<1x8x1xf32>
    %126 = vector.broadcast %125 : vector<1x8x1xf32> to vector<1x8x16xf32>
    %127 = arith.subf %123, %126 : vector<1x8x16xf32>
    %128 = math.exp %127 : vector<1x8x16xf32>
    %cst_42 = arith.constant dense<0.000000e+00> : vector<1x8xf32>
    %129 = vector.multi_reduction <add>, %128, %cst_42 [2] : vector<1x8x16xf32> to vector<1x8xf32>
    %130 = vector.shape_cast %129 : vector<1x8xf32> to vector<1x8x1xf32>
    %131 = tpu.reciprocal %130 {approx = true} : vector<1x8x1xf32> -> vector<1x8x1xf32>
    %132 = vector.broadcast %131 : vector<1x8x1xf32> to vector<1x8x16xf32>
    %133 = arith.mulf %128, %132 : vector<1x8x16xf32>
    %134 = arith.truncf %133 : vector<1x8x16xf32> to vector<1x8x16xbf16>
    %135 = vector.extract_strided_slice %72 {offsets = [0, 0, 24], sizes = [1, 16, 8], strides = [1, 1, 1]} : vector<1x16x32xbf16> to vector<1x16x8xbf16>
    "tpu.trace_start"() <{level = 10 : i32, message = "bqk,bkd->bqd"}> : () -> ()
    %cst_43 = arith.constant dense<0.000000e+00> : vector<1x8x8xf32>
    %136 = tpu.matmul %134, %135, %cst_43 {dimension_numbers = #tpu.dot_dimension_numbers<[2], [1], [1], [2], [0, 0, 0, 1, 1, 2], [0], [0]>} : vector<1x8x16xbf16>, vector<1x16x8xbf16>, vector<1x8x8xf32> -> vector<1x8x8xf32>
    "tpu.trace_stop"() : () -> ()
    %137 = tpu.concatenate %88, %104, %120, %136 in 2 : vector<1x8x8xf32>, vector<1x8x8xf32>, vector<1x8x8xf32>, vector<1x8x8xf32> -> vector<1x8x32xf32>
    %c0_44 = arith.constant 0 : index
    %c0_45 = arith.constant 0 : index
    %c0_46 = arith.constant 0 : index
    %138 = vector.load %arg9[%c0_44, %c0_45, %c0_46] : memref<1x8x32xf32, #tpu.memory_space<vmem>>, vector<1x8x32xf32>
    tpu.vector_store %arg9[%c0_44, %c0_45, %c0_46], %137 {strides = array<i32>} : memref<1x8x32xf32, #tpu.memory_space<vmem>>, vector<1x8x32xf32>,
    return
  }
  func.func @transform_0(%arg0: i32) -> (i32, i32, i32) {
    %c0_i32 = arith.constant 0 : i32
    %c0_i32_0 = arith.constant 0 : i32
    %c0_i32_1 = arith.constant 0 : i32
    return %arg0, %c0_i32, %c0_i32_0 : i32, i32, i32
  }
  func.func @transform_1(%arg0: i32) -> (i32, i32, i32) {
    %c0_i32 = arith.constant 0 : i32
    %c0_i32_0 = arith.constant 0 : i32
    %c0_i32_1 = arith.constant 0 : i32
    return %arg0, %c0_i32, %c0_i32_0 : i32, i32, i32
  }
  func.func @transform_2(%arg0: i32) -> (i32, i32) {
    %c0_i32 = arith.constant 0 : i32
    %c0_i32_0 = arith.constant 0 : i32
    %c0_i32_1 = arith.constant 0 : i32
    return %c0_i32, %c0_i32_0 : i32, i32
  }
  func.func @transform_3(%arg0: i32) -> (i32, i32) {
    %c0_i32 = arith.constant 0 : i32
    %c0_i32_0 = arith.constant 0 : i32
    %c0_i32_1 = arith.constant 0 : i32
    return %c0_i32, %c0_i32_0 : i32, i32
  }
  func.func @transform_4(%arg0: i32) -> (i32, i32) {
    %c0_i32 = arith.constant 0 : i32
    %c0_i32_0 = arith.constant 0 : i32
    %c0_i32_1 = arith.constant 0 : i32
    return %c0_i32, %c0_i32_0 : i32, i32
  }
  func.func @transform_5(%arg0: i32) -> (i32, i32) {
    %c0_i32 = arith.constant 0 : i32
    %c0_i32_0 = arith.constant 0 : i32
    %c0_i32_1 = arith.constant 0 : i32
    return %c0_i32, %c0_i32_0 : i32, i32
  }
  func.func @transform_6(%arg0: i32) -> (i32, i32) {
    %c0_i32 = arith.constant 0 : i32
    %c0_i32_0 = arith.constant 0 : i32
    %c0_i32_1 = arith.constant 0 : i32
    return %c0_i32, %c0_i32_0 : i32, i32
  }
  func.func @transform_7(%arg0: i32) -> (i32, i32) {
    %c0_i32 = arith.constant 0 : i32
    %c0_i32_0 = arith.constant 0 : i32
    %c0_i32_1 = arith.constant 0 : i32
    return %c0_i32, %c0_i32_0 : i32, i32
  }
  func.func @transform_8(%arg0: i32) -> (i32, i32, i32) {
    %c0_i32 = arith.constant 0 : i32
    %c0_i32_0 = arith.constant 0 : i32
    %c0_i32_1 = arith.constant 0 : i32
    return %arg0, %c0_i32, %c0_i32_0 : i32, i32, i32
  }
}

</mosaic_0001>

<bundles_post_ra>
// kernel: tpu_custom_call.1
= control target key start
LH: loop header
LB: loop body
LE: loop exit
PB: predicated region body
PF: predicated region fallthrough
CT: control target
= control target key end

     0   :  { %s1946_s0 = inlined_call_operand.hbm [shape: bf16[2,8,32], index: 0, kind: input, shape index: {}]   ;;  %s1947_s1 = inlined_call_operand.hbm [shape: bf16[2,8,32], index: 1, kind: input, shape index: {}]   ;;  %s1948_s2 = inlined_call_operand.hbm [shape: bf16[32,96], index: 2, kind: input, shape index: {}]   ;;  %s1949_s3 = inlined_call_operand.hbm [shape: bf16[32,64], index: 3, kind: input, shape index: {}]   ;;  %s1950_s4 = inlined_call_operand.vmem [shape: f32[1,32], index: 4, kind: input, shape index: {}]   ;;  %s1951_s5 = inlined_call_operand.vmem [shape: f32[1,32], index: 5, kind: input, shape index: {}]   ;;  %s1952_s6 = inlined_call_operand.vmem [shape: f32[1,32], index: 6, kind: input, shape index: {}]   ;;  %s1953_s7 = inlined_call_operand.vmem [shape: f32[1,32], index: 7, kind: input, shape index: {}]   ;;  %s1954_s8 = inlined_call_operand.hbm [shape: f32[2,8,32], index: 8, kind: output, shape index: {}]  }
   0x1   :  { %1962 = sst [smem:[#allocation19_spill]] %s1948_s2 }
   0x2   :  { %1963 = sst [smem:[#allocation20_spill]] %s1949_s3 }
   0x3   :  { %13 = vsyncpa [#allocation3], 0 }
   0x4   :  { %15 = vsyncpa [#allocation3 + $0x1], 0 }
   0x5   :  { %16 = vsyncpa [#allocation6], 0 }
   0x6   :  { %18 = vsyncpa [#allocation6 + $0x1], 0 }
   0x7   :  { %19 = vsyncpa [#allocation9], 0 }
   0x8   :  { %20 = vsyncpa [#allocation4], 0 }
   0x9   :  { %22 = vsyncpa [#allocation4 + $0x1], 0  ;;  %s1638_s27 = smov 0   ;;  %s1640_s28 = smov 0  }
   0xa   :  { %s1642_s29 = smov 0   ;;  %s1644_s30 = smov 0  }
   0xb LB: > { %1964 = sst [smem:[#allocation16_spill]] %s1568_s29  ;;  %s1659_s9 = sadd.s32 4294967295, %s1572_s30   ;;  %s1572_s30 = sphi %s1644_s30, %s1985_s30   ;;  %s1568_s29 = sphi %s1642_s29, %s1987_s29   ;;  %s1564_s28 = sphi %s1640_s28, %s1989_s28   ;;  %s1560_s27 = sphi %s1638_s27, %s1988_s27  }
   0xc   : > { %s1155_s10 = sadd.s32 4294967294, %s1572_s30   ;;  %p48_p0 = scmp.ne.s32.totalorder %s1564_s28, %s1560_s27 }
   0xd   : > { %p1955_p1 = scmp.eq.s32.totalorder %s1659_s9, 0  ;;  %p230_p3 = scmp.eq.s32.totalorder %s1155_s10, 1 }
   0xe   : > { %p1156_p5 = scmp.ge.s32.totalorder %s1572_s30, 1  ;;  %p237_p7 = scmp.lt.s32.totalorder %s1572_s30, 3 }
   0xf   : > { %p1668_p4 = por %p1955_p1, %p48_p0  ;;  %p1673_p6 = por %p230_p3, %p48_p0 }
  0x10   : > { %p1678_p8 = pnand %p1156_p5, %p237_p7  ;;  %s1574_s14 = smov [#allocation7]  }
  0x11   : > { %s1965_s11 = scalar_select %p1668_p4, 1, 0 }
  0x12   : > { %s1966_s12 = scalar_select %p1673_p6, 1, 0 }
  0x13   : > { %s1967_s13 = scalar_select %p1678_p8, 1, 0 }
  0x14   : > { %s249_s15 = sshll.u32 %s1574_s14, 4  ;;  %p1292_p9 = pneg %p1678_p8  ;;  %s250_s15 = int_to_ptr.vmem [resolvable:$true] %s249_s15 }
  0x15   : > { %s1575_s17 = smov [#allocation8]   ;;  %s1399_s19 = scalar_lea.vmem %s250_s15, 256 }
  0x16   : > { %p1687_p11 = pnand %p1292_p9, %p1955_p1  ;;  %s262_s18 = sshll.u32 %s1575_s17, 4  ;;  %s263_s18 = int_to_ptr.vmem [resolvable:$true] %s262_s18 }
  0x17   : > { %p1400_p13 = scmp.ne.s32.totalorder %s250_s15, %s1399_s19  ;;  %p1407_p5 = scmp.lt.s32.totalorder %s250_s15, %s250_s15 }
  0x18   : > { %p1390_p12 = pneg %p1687_p11  ;;  %p1408_p7 = scmp.lt.s32.totalorder %s1399_s19, %s1399_s19 }
  0x1a   : > { %p1402_p0 = pnand %p1400_p13, %p1390_p12  ;;  %p1409_p10 = por %p1408_p7, %p1407_p5 }
  0x1c   : > { %p1403_p3 = pneg %p1402_p0 }
  0x1e   : > { %p1410_p9 = pnand %p1409_p10, %p1403_p3 }
  0x20   : > { %1413 = shalt.err (!%p1410_p9)
}
  0x21   : > { %s1576_s20 = smov 64   ;;  %s1577_s21 = smov 4  }
  0x22   : > { %s1969_s2 = sld [smem:[#allocation19_spill]]  ;;  %s1425_s24 = scalar_lea.vmem %s263_s18, 256 }
  0x23   : > { %p1426_p1 = scmp.ne.s32.totalorder %s263_s18, %s1425_s24  ;;  %p1433_p2 = scmp.lt.s32.totalorder %s263_s18, %s263_s18 }
  0x24   : > { %p1434_p6 = scmp.lt.s32.totalorder %s1425_s24, %s1425_s24 }
  0x25   : > { %p1428_p13 = pnand %p1426_p1, %p1390_p12 }
  0x26   : > { %p1435_p5 = por %p1434_p6, %p1433_p2 }
  0x27   : > { %p1429_p0 = pneg %p1428_p13 }
  0x28   : > { %1295 = dma.hbm_to_vmem [thread:$0]  (!%p1687_p11), %s1969_s2, 256, %s250_s15, [#allocation6], %s1576_s20, %s1576_s20, %s1577_s21  }
  0x29   : > { %p1436_p10 = pnand %p1435_p5, %p1429_p0 }
  0x2b   : > { %1439 = shalt.err (!%p1436_p10)
}
  0x2c   : > { %s1970_s3 = sld [smem:[#allocation20_spill]]  ;;  %s1710_s10 = sadd.s32 1, %s1572_s30  }
  0x2d   : > { %1971 = sst [smem:[#allocation17_spill]] %s1710_s10  ;;  %s35_s14 = sadd.s32 1, %s1568_s29 }
  0x2e   : > { %s32_s15 = ssub.s32 %s1572_s30, %s1710_s10  ;;  %p42_p1 = scmp.ne.s32.totalorder %s1568_s29, %s1564_s28 }
  0x2f   : > { %p33_p2 = scmp.eq.s32.totalorder %s32_s15, 0  ;;  %p43_p6 = scmp.eq.s32.totalorder %s1572_s30, 0 }
  0x30   : > { %p1972_p12 = scmp.eq.s32.totalorder %s1659_s9, 1  ;;  %p1312_p7 = scmp.lt.s32.totalorder %s1572_s30, 2 }
  0x31   : > { %s1726_s17 = scalar_select %p33_p2, %s1568_s29, %s35_s14  }
  0x32   : > { %1298 = dma.hbm_to_vmem [thread:$0]  (!%p1687_p11), %s1970_s3, 256, %s263_s18, [#allocation9], %s1576_s20, %s1576_s20, %s1577_s21  }
  0x33   : > { %p1720_p3 = por %p1972_p12, %p42_p1  ;;  %1974 = sst [smem:[#allocation18_spill]] %s1726_s17 }
  0x34   : > { %p44_p9 = por %p43_p6, %p42_p1  ;;  %s288_s19 = sand.u32 1, %s1568_s29  }
  0x35   : > { %s1973_s16 = scalar_select %p1720_p3, 1, 0 }
  0x36   : > { %s1729_s18 = sshll.u32 %s288_s19, 2  ;;  %s1161_s20 = sshll.u32 %s1572_s30, 6 }
  0x37   : > { %s1735_s23 = scalar_lea.hbm %s1946_s0, %s1161_s20  ;;  %s292_s24 = scalar_lea.vmem [#allocation2], %s1729_s18 }
  0x38   : > { %s299_s25 = sshll.u32 %s292_s24, 4  ;;  %p1740_p11 = pnand %p1312_p7, %p44_p9  ;;  %s1738_s25 = int_to_ptr.vmem [resolvable:$true] %s299_s25 }
  0x39   : > { %s1747_s2 = scalar_lea.hbm %s1947_s1, %s1161_s20  ;;  %s306_s21 = sand.u32 1, %s1572_s30  }
  0x3a   : > { %s289_s22 = scalar_lea.sflag [#allocation3], %s288_s19  ;;  %s1440_s3 = scalar_lea.hbm %s1735_s23, 64 }
  0x3b   : > { %p1441_p13 = scmp.ne.s32.totalorder %s1735_s23, %s1440_s3  ;;  %p1442_p0 = pneg %p1740_p11 }
  0x3c   : > { %s1445_s29 = scalar_lea.hbm %s1946_s0, 128  ;;  %p1446_p1 = scmp.lt.s32.totalorder %s1735_s23, %s1946_s0 }
  0x3d   : > { %p1443_p5 = pnand %p1442_p0, %p1441_p13  ;;  %p1447_p2 = scmp.lt.s32.totalorder %s1445_s29, %s1440_s3 }
  0x3f   : > { %p1444_p10 = pneg %p1443_p5  ;;  %p1448_p6 = por %p1447_p2, %p1446_p1 }
  0x41   : > { %p1449_p12 = pnand %p1448_p6, %p1444_p10 }
  0x43   : > { %1452 = shalt.err (!%p1449_p12)
}
  0x44   : > { %s1453_s19 = scalar_lea.vmem %s1738_s25, 64  ;;  %s1578_s17 = smov [#allocation2]  }
  0x45   : > { %p1454_p7 = scmp.ne.s32.totalorder %s1738_s25, %s1453_s19  ;;  %s1458_s20 = sshll.u32 %s1578_s17, 4  ;;  %s1459_s20 = int_to_ptr.vmem [resolvable:$false] %s1458_s20 }
  0x46   : > { %s1460_s15 = scalar_lea.vmem %s1459_s20, 128  ;;  %p1461_p5 = scmp.lt.s32.totalorder %s1738_s25, %s1459_s20 }
  0x47   : > { %p1456_p9 = pnand %p1454_p7, %p1442_p0  ;;  %p1462_p3 = scmp.lt.s32.totalorder %s1460_s15, %s1453_s19 }
  0x49   : > { %p1457_p13 = pneg %p1456_p9  ;;  %p1463_p4 = por %p1462_p3, %p1461_p5 }
  0x4b   : > { %p1464_p1 = pnand %p1463_p4, %p1457_p13 }
  0x4d   : > { %1467 = shalt.err (!%p1464_p1)
}
  0x4e   : > { %1302 = dma.hbm_to_vmem [thread:$0]  (!%p1740_p11), %s1735_s23, 64, %s1738_s25, %s289_s22  }
  0x4f   : > { %s310_s3 = scalar_lea.vmem [#allocation5], %s1729_s18  ;;  %s307_s10 = scalar_lea.sflag [#allocation6], %s306_s21 }
  0x50   : > { %s317_s29 = sshll.u32 %s310_s3, 4  ;;  %s1468_s24 = scalar_lea.hbm %s1747_s2, 64  ;;  %s318_s29 = int_to_ptr.vmem [resolvable:$true] %s317_s29 }
  0x51   : > { %p1469_p3 = scmp.ne.s32.totalorder %s1747_s2, %s1468_s24  ;;  %s1473_s17 = scalar_lea.hbm %s1947_s1, 128 }
  0x52   : > { %p1474_p2 = scmp.lt.s32.totalorder %s1747_s2, %s1947_s1  ;;  %p1475_p6 = scmp.lt.s32.totalorder %s1473_s17, %s1468_s24 }
  0x53   : > { %p1471_p4 = pnand %p1469_p3, %p1442_p0 }
  0x54   : > { %p1476_p12 = por %p1475_p6, %p1474_p2 }
  0x55   : > { %p1472_p10 = pneg %p1471_p4 }
  0x57   : > { %p1477_p7 = pnand %p1476_p12, %p1472_p10 }
  0x59   : > { %1480 = shalt.err (!%p1477_p7)
}
  0x5a   : > { %s1481_s18 = scalar_lea.vmem %s318_s29, 64  ;;  %s1579_s23 = smov [#allocation5]  }
  0x5b   : > { %p1482_p9 = scmp.ne.s32.totalorder %s318_s29, %s1481_s18  ;;  %s1486_s25 = sshll.u32 %s1579_s23, 4  ;;  %s1487_s25 = int_to_ptr.vmem [resolvable:$false] %s1486_s25 }
  0x5c   : > { %s1488_s21 = scalar_lea.vmem %s1487_s25, 128  ;;  %p1489_p1 = scmp.lt.s32.totalorder %s318_s29, %s1487_s25 }
  0x5d   : > { %p1484_p13 = pnand %p1482_p9, %p1442_p0  ;;  %p1490_p3 = scmp.lt.s32.totalorder %s1488_s21, %s1481_s18 }
  0x5f   : > { %p1485_p5 = pneg %p1484_p13  ;;  %p1491_p4 = por %p1490_p3, %p1489_p1 }
  0x61   : > { %p1492_p8 = pnand %p1491_p4, %p1485_p5 }
  0x63   : > { %1495 = shalt.err (!%p1492_p8)
}
  0x64   : > { %1305 = dma.hbm_to_vmem [thread:$0]  (!%p1740_p11), %s1747_s2, 64, %s318_s29, %s307_s10  }
  0x65   : > { %p1976_p10 = scmp.ne.s32.totalorder %s1967_s13, 0 }
  0x66   : > { %s1798_s22 = sand.u32 (!%p1976_p10), 1, %s1564_s28   ;;  %p1977_p0 = scmp.ne.s32.totalorder (!%p1976_p10), %s1965_s11, 0 }
  0x67   : > { %326 = sbr.rel (%p1976_p10) target bundleno = 1717 (0x6b5), region = 52  ;;  %s1165_s3 = sshll.u32 (!%p1976_p10), %s1798_s22, 2 }
  0x68   : > { %s329_s24 = scalar_lea.sflag (!%p1976_p10), [#allocation3], %s1798_s22  ;;  %s332_s14 = scalar_lea.vmem (!%p1976_p10), [#allocation2], %s1165_s3 }
  0x6c   : > { %1539 = dma.done.wait (%p1977_p0), %s329_s24, 64  }
  0x6d   : > { %1541 = vsyncadd (%p1977_p0), %s329_s24, 4294967232  ;;  %s337_s2 = sand.u32 1, %s1659_s9   ;;  %s341_s13 = scalar_lea.vmem [#allocation5], %s1165_s3 }
  0x6e   : > { %s338_s26 = scalar_lea.sflag [#allocation6], %s337_s2 }
  0x6f   : > { %1543 = dma.done.wait (%p1977_p0), %s338_s26, 64  }
  0x70   : > { %1545 = vsyncadd (%p1977_p0), %s338_s26, 4294967232  ;;  %p1978_p8 = scmp.eq.s32.totalorder %s1659_s9, 0 }
  0x72   : > { %1547 = dma.done.wait (%p1978_p8), [#allocation6], 256   ;;  %p1979_p11 = pmov %p1978_p8 }
  0x73   : > { %p1980_p2 = pmov %p1978_p8 }
  0x74   : > { %1549 = vsyncadd (%p1979_p11), [#allocation6], 4294967040 }
  0x75   : > { %1551 = dma.done.wait (%p1980_p2), [#allocation9], 256   ;;  %p1981_p6 = pmov %p1980_p2 }
  0x76   : > { %vm394_vm0 = vcmask 261120   ;;  %v390_v0 = vld [vmem:[%s341_s13] sm:$0xf]  ;;  %v388_v1 = vld [vmem:[%s332_s14] sm:$0xf]  ;;  %v1364_v16 = vld [vmem:[#allocation7 + $0x8] sm:$0xff]  }
  0x77   : > { %1553 = vsyncadd (%p1981_p6), [#allocation9], 4294967040  ;;  %v391_v2 = vunpack.c.l.bf16 %v390_v0  ;;  %v389_v3 = vunpack.c.l.bf16 %v388_v1  ;;  %v1366_v17 = vld [vmem:[#allocation8 + $0x8] sm:$0xff]   ;;  %v1580_v18 = vmov 0.0   ;;  %v1365_v19 = vld [vmem:[#allocation7] sm:$0xff]   ;;  %vm1581_vm1 = vmmov 0  }
  0x78   : > { %1214 = vmatprep.subr.bf16.mxu0 %v1580_v18  ;;  %1222 = vmatprep.subr.bf16.mxu1 %v1580_v18  ;;  %v1367_v20 = vld [vmem:[#allocation8] sm:$0xff]   ;;  %s1582_s23 = smov 96   ;;  %s1583_s25 = smov 112   ;;  %vm578_vm2 = vcmask 1043456   ;;  %vm582_vm3 = vcmask 64512   ;;  %vm628_vm4 = vcmask 130048  }
  0x79   : > { %v426_v4 = vsel %vm394_vm0, %v391_v2, 0.0  ;;  %v395_v5 = vsel %vm394_vm0, %v389_v3, 0.0  ;;  %1215 = vmatpush3.bf16.msra.mxu0 %v1364_v16  ;;  %1223 = vmatpush3.bf16.msra.mxu1 %v1366_v17  ;;  %v1172_v28 = vld [vmem:[%s1952_s6] ss:$0 sm:$0xff]  ;;  %s1584_s21 = smov 104   ;;  %s1585_s3 = smov 120  }
  0x7a   : > { %427 = vadd.xlane.f32.xlu0 %v426_v4  ;;  %1216 = vmatprep.subr.bf16.mxu0 %v1580_v18  ;;  %v1173_v30 = vld [vmem:[%s1953_s7] ss:$0 sm:$0xff]  ;;  %s1586_s24 = smov 80   ;;  %s1587_s14 = smov 72   ;;  %vm1026_vm5 = vcmask 195584  }
  0x7b   : > { %1218 = vmatprep.mubr.msk.bf16.mxu0 %vm1581_vm1, %v1580_v18  ;;  %1224 = vmatprep.subr.bf16.mxu1 %v1580_v18  ;;  %v1170_v33 = vld [vmem:[%s1950_s4] ss:$0 sm:$0xff]  ;;  %s1588_s2 = smov 88   ;;  %s1589_s26 = smov 8  }
  0x7c   : > { %1226 = vmatprep.mubr.msk.bf16.mxu1 %vm1581_vm1, %v1580_v18  ;;  %v1171_v36 = vld [vmem:[%s1951_s5] ss:$0 sm:$0xff]  ;;  %s1590_s13 = smov 16   ;;  %s1591_s11 = smov 24  }
  0x7d   : > { %1217 = vmatpush3.bf16.msra.mxu0 %v1365_v19  ;;  %1225 = vmatpush3.bf16.msra.mxu1 %v1367_v20  ;;  %s1169_s29 = sshll.u32 %s1798_s22, 3  ;;  %s1189_s10 = sshll.u32 %s1659_s9, 7 }
  0x7e   : > { %396 = vadd.xlane.f32.xlu0 %v395_v5  ;;  %1230 = vmatprep.subr.bf16.mxu0 %v1580_v18  ;;  %s386_s19 = scalar_lea.vmem [#allocation10], %s1169_s29  ;;  %s1908_s18 = scalar_lea.hbm %s1954_s8, %s1189_s10 }
  0x7f   : > { %1236 = vmatprep.subr.bf16.mxu1 %v1580_v18  ;;  %s1043_s17 = sshll.u32 %s386_s19, 4  ;;  %p1982_p7 = scmp.ne.s32.totalorder %s1973_s16, 0  ;;  %s1044_s17 = int_to_ptr.vmem [resolvable:$true] %s1043_s17 }
  0x80   : > { %s1592_s9 = smov [#allocation10]  }
 0x103   : > { %v428_v6 = vpop.xlane.xlu0 %427 }
 0x104   : > { %v429_v7 = vmul.f32 0.03125, %v428_v6 }
 0x106   : > { %v430_v8 = vsub.f32 %v391_v2, %v429_v7 }
 0x107   : > { %v397_v9 = vpop.xlane.xlu0 %396 }
 0x108   : > { %v399_v10 = vmul.f32 0.03125, %v397_v9  ;;  %v431_v11 = vmul.f32 %v430_v8, %v430_v8 }
 0x10a   : > { %v400_v12 = vsub.f32 %v389_v3, %v399_v10  ;;  %v432_v13 = vsel %vm394_vm0, %v431_v11, 0.0 }
 0x10b   : > { %433 = vadd.xlane.f32.xlu1 %v432_v13 }
 0x10c   : > { %v401_v14 = vmul.f32 %v400_v12, %v400_v12 }
 0x10e   : > { %v402_v15 = vsel %vm394_vm0, %v401_v14, 0.0 }
 0x10f   : > { %403 = vadd.xlane.f32.xlu1 %v402_v15 }
 0x194   : > { %v434_v21 = vpop.xlane.xlu1 %433 }
 0x195   : > { %v435_v22 = vmul.f32 0.03125, %v434_v21 }
 0x197   : > { %v436_v23 = vadd.f32 1e-05, %v435_v22 }
 0x198   : > { %v404_v24 = vpop.xlane.xlu1 %403 }
 0x199   : > { %1368 = vrsqrt.f32 %v436_v23  ;;  %v405_v25 = vmul.f32 0.03125, %v404_v24 }
 0x19b   : > { %v406_v26 = vadd.f32 1e-05, %v405_v25 }
 0x19d   : > { %1370 = vrsqrt.f32 %v406_v26 }
 0x1a6   : > { %v1369_v27 = vpop.eup %1368 }
 0x1a7   : > { %v438_v29 = vmul.f32 %v1369_v27, %v430_v8 }
 0x1a9   : > { %v445_v31 = vmul.f32 %v1172_v28, %v438_v29 }
 0x1aa   : > { %v1371_v32 = vpop.eup %1370 }
 0x1ab   : > { %v452_v34 = vadd.f32 %v1173_v30, %v445_v31  ;;  %v408_v35 = vmul.f32 %v1371_v32, %v400_v12 }
 0x1ad   : > { %v453_v37 = vpack.c.bf16 %v452_v34, %v452_v34  ;;  %v415_v38 = vmul.f32 %v1170_v33, %v408_v35 }
 0x1af   : > { %1219 = vmatmul.mubr.msk.bf16.vlgmr.msra.gmra.mxu0 %vm394_vm0, %v453_v37  ;;  %v422_v39 = vadd.f32 %v1171_v36, %v415_v38 }
 0x1b0   : > { %1232 = vmatprep.mubr.msk.bf16.mxu0 %vm1581_vm1, %v1580_v18 }
 0x1b1   : > { %v423_v40 = vpack.c.bf16 %v422_v39, %v422_v39 }
 0x1b3   : > { %1227 = vmatmul.mubr.msk.bf16.vlgmr.msra.gmra.mxu1 %vm394_vm0, %v423_v40 }
 0x1b4   : > { %1238 = vmatprep.mubr.msk.bf16.mxu1 %vm1581_vm1, %v1580_v18 }
 0x26f   : > { %v507_v41 = vpop.f32.mrf.mxu0 }
 0x270   : > { %v572_v42 = vpack.c.bf16 %v507_v41, %v507_v41 }
 0x271   : > { %v1220_v43 = vpop.f32.mrf.mxu0 }
 0x272   : > { %v575_v44 = vrot.slane %v572_v42, 4 }
 0x273   : > { %v510_v45 = vpop.f32.mrf.mxu0  ;;  %v566_v46 = vpop.f32.mrf.mxu1 }
 0x274   : > { %576 = vrot.lane.b32.xlu0 %v575_v44, %s1582_s23  ;;  %v573_v51 = vpack.c.bf16 %v566_v46, %v566_v46 }
 0x275   : > { %v1221_v47 = vpop.f32.mrf.mxu0  ;;  %v1228_v48 = vpop.f32.mrf.mxu1 }
 0x277   : > { %v569_v49 = vpop.f32.mrf.mxu1 }
 0x278   : > { %796 = vrot.lane.b32.xlu0 %v572_v42, %s1583_s25 }
 0x279   : > { %v1229_v50 = vpop.f32.mrf.mxu1 }
 0x27c   : > { %904 = vrot.lane.b32.xlu0 %v572_v42, %s1584_s21 }
 0x2e6   : > { %v577_v52 = vpop.permute.xlu0 %576 }
 0x2e7   : > { %v1852_v53 = vsel %vm578_vm2, %v573_v51, %v577_v52 }
 0x2e8   : > { %690 = vrot.lane.b32.xlu1 %v1852_v53, %s1585_s3  ;;  %v586_v54 = vsel %vm582_vm3, %v1852_v53, 0 }
 0x2e9   : > { %1231 = vmatpush3.bf16.xpose.msra.mxu0 %v586_v54 }
 0x2ea   : > { %1242 = vmatprep.subr.bf16.mxu0 %v1580_v18  ;;  %v797_v61 = vpop.permute.xlu0 %796 }
 0x2ec   : > { %688 = vrot.lane.b32.xlu1 %v572_v42, %s1585_s3 }
 0x2ee   : > { %v905_v63 = vpop.permute.xlu0 %904 }
 0x2f0   : > { %798 = vrot.lane.b32.xlu1 %v1852_v53, %s1583_s25  ;;  %1233 = vmatmul.mubr.msk.bf16.vlgmr.msra.gmra.mxu0 %vm582_vm3, %v572_v42  ;;  %s1496_s25 = scalar_lea.vmem %s1044_s17, 128 }
 0x2f1   : > { %1244 = vmatprep.mubr.msk.bf16.mxu0 %vm1581_vm1, %v1580_v18  ;;  %p1497_p12 = scmp.ne.s32.totalorder %s1044_s17, %s1496_s25 }
 0x2f3   : > { %p1498_p9 = pnand %p1497_p12, %p1982_p7 }
 0x2f4   : > { %906 = vrot.lane.b32.xlu1 %v1852_v53, %s1584_s21  ;;  %s1500_s21 = sshll.u32 %s1592_s9, 4  ;;  %s1501_s21 = int_to_ptr.vmem [resolvable:$false] %s1500_s21 }
 0x2f5   : > { %p1499_p13 = pneg %p1498_p9  ;;  %s1502_s3 = scalar_lea.vmem %s1501_s21, 256 }
 0x2f6   : > { %p1503_p5 = scmp.lt.s32.totalorder %s1044_s17, %s1501_s21  ;;  %p1504_p1 = scmp.lt.s32.totalorder %s1502_s3, %s1496_s25 }
 0x2f8   : > { %p1505_p3 = por %p1504_p1, %p1503_p5 }
 0x2fa   : > { %p1506_p4 = pnand %p1505_p3, %p1499_p13 }
 0x35a   : > { %v691_v55 = vpop.permute.xlu1 %690 }
 0x35b   : > { %v696_v56 = vsel %vm582_vm3, %v691_v55, 0 }
 0x35c   : > { %1243 = vmatpush3.bf16.xpose.msra.mxu0 %v696_v56 }
 0x35d   : > { %1254 = vmatprep.subr.bf16.mxu0 %v1580_v18 }
 0x35e   : > { %v689_v57 = vpop.permute.xlu1 %688 }
 0x362   : > { %v799_v58 = vpop.permute.xlu1 %798 }
 0x363   : > { %v804_v59 = vsel %vm582_vm3, %v799_v58, 0  ;;  %1245 = vmatmul.mubr.msk.bf16.vlgmr.msra.gmra.mxu0 %vm582_vm3, %v689_v57 }
 0x364   : > { %1255 = vmatpush3.bf16.xpose.msra.mxu0 %v804_v59  ;;  %1256 = vmatprep.mubr.msk.bf16.mxu0 %vm1581_vm1, %v1580_v18 }
 0x365   : > { %1266 = vmatprep.subr.bf16.mxu0 %v1580_v18 }
 0x366   : > { %v907_v60 = vpop.permute.xlu1 %906 }
 0x367   : > { %v912_v62 = vsel %vm582_vm3, %v907_v60, 0 }
 0x36b   : > { %1257 = vmatmul.mubr.msk.bf16.vlgmr.msra.gmra.mxu0 %vm582_vm3, %v797_v61 }
 0x36c   : > { %1267 = vmatpush3.bf16.xpose.msra.mxu0 %v912_v62  ;;  %1268 = vmatprep.mubr.msk.bf16.mxu0 %vm1581_vm1, %v1580_v18 }
 0x373   : > { %1269 = vmatmul.mubr.msk.bf16.vlgmr.msra.gmra.mxu0 %vm582_vm3, %v905_v63 }
 0x3b0   : > { %v622_v0 = vpop.f32.mrf.mxu0 }
 0x3b1   : > { %v629_v1 = vsel %vm628_vm4, %v622_v0, -inf }
 0x3b2   : > { %630 = vmax.xlane.f32.xlu1 %v629_v1  ;;  %v1234_v2 = vpop.f32.mrf.mxu0 }
 0x3b4   : > { %v625_v3 = vpop.f32.mrf.mxu0 }
 0x3b6   : > { %v1235_v4 = vpop.f32.mrf.mxu0 }
 0x423   : > { %v732_v5 = vpop.f32.mrf.mxu0 }
 0x424   : > { %v738_v6 = vsel %vm628_vm4, %v732_v5, -inf }
 0x425   : > { %739 = vmax.xlane.f32.xlu0 %v738_v6  ;;  %v1246_v7 = vpop.f32.mrf.mxu0 }
 0x427   : > { %v735_v8 = vpop.f32.mrf.mxu0 }
 0x429   : > { %v1247_v9 = vpop.f32.mrf.mxu0 }
 0x42b   : > { %v840_v10 = vpop.f32.mrf.mxu0 }
 0x42c   : > { %v846_v11 = vsel %vm628_vm4, %v840_v10, -inf }
 0x42d   : > { %847 = vmax.xlane.f32.xlu0 %v846_v11  ;;  %v1258_v12 = vpop.f32.mrf.mxu0 }
 0x42f   : > { %v843_v13 = vpop.f32.mrf.mxu0 }
 0x431   : > { %v1259_v14 = vpop.f32.mrf.mxu0 }
 0x433   : > { %v948_v15 = vpop.f32.mrf.mxu0 }
 0x434   : > { %v954_v16 = vsel %vm628_vm4, %v948_v15, -inf }
 0x435   : > { %955 = vmax.xlane.f32.xlu0 %v954_v16  ;;  %v1270_v17 = vpop.f32.mrf.mxu0 }
 0x437   : > { %v951_v19 = vpop.f32.mrf.mxu0 }
 0x439   : > { %v1271_v20 = vpop.f32.mrf.mxu0 }
 0x43b   : > { %v631_v21 = vpop.xlane.xlu1 %630 }
 0x43c   : > { %v632_v22 = vsub.f32 %v622_v0, %v631_v21 }
 0x43e   : > { %v633_v23 = vmul.f32 1.442695, %v632_v22 }
 0x440   : > { %1372 = vpow2.f32 %v633_v23 }
 0x44d   : > { %v1373_v24 = vpop.eup %1372 }
 0x44e   : > { %v635_v25 = vsel %vm628_vm4, %v1373_v24, 0.0 }
 0x44f   : > { %636 = vadd.xlane.f32.xlu1 %v635_v25 }
 0x460   : > { %642 = vrot.lane.b32.xlu1 %v1852_v53, %s1582_s23  ;;  %s1030_s23 = scalar_lea.sflag [#allocation4], %s1798_s22 }
 0x4ae   : > { %v740_v26 = vpop.xlane.xlu0 %739 }
 0x4af   : > { %v741_v27 = vsub.f32 %v732_v5, %v740_v26 }
 0x4b1   : > { %v742_v28 = vmul.f32 1.442695, %v741_v27 }
 0x4b3   : > { %1374 = vpow2.f32 %v742_v28 }
 0x4b6   : > { %v848_v29 = vpop.xlane.xlu0 %847 }
 0x4b7   : > { %v849_v30 = vsub.f32 %v840_v10, %v848_v29 }
 0x4b9   : > { %v850_v31 = vmul.f32 1.442695, %v849_v30 }
 0x4bb   : > { %1376 = vpow2.f32 %v850_v31 }
 0x4be   : > { %v956_v32 = vpop.xlane.xlu0 %955 }
 0x4bf   : > { %v957_v33 = vsub.f32 %v948_v15, %v956_v32 }
 0x4c0   : > { %v1375_v34 = vpop.eup %1374 }
 0x4c1   : > { %v958_v35 = vmul.f32 1.442695, %v957_v33  ;;  %v744_v36 = vsel %vm628_vm4, %v1375_v34, 0.0 }
 0x4c2   : > { %745 = vadd.xlane.f32.xlu0 %v744_v36 }
 0x4c3   : > { %1378 = vpow2.f32 %v958_v35 }
 0x4c8   : > { %v1377_v37 = vpop.eup %1376 }
 0x4c9   : > { %v852_v38 = vsel %vm628_vm4, %v1377_v37, 0.0 }
 0x4ca   : > { %853 = vadd.xlane.f32.xlu1 %v852_v38 }
 0x4d0   : > { %v1379_v39 = vpop.eup %1378 }
 0x4d1   : > { %v960_v40 = vsel %vm628_vm4, %v1379_v39, 0.0 }
 0x4d2   : > { %961 = vadd.xlane.f32.xlu0 %v960_v40 }
 0x4d8   : > { %v637_v41 = vpop.xlane.xlu1 %636 }
 0x4d9   : > { %1380 = vrcp.f32 %v637_v41 }
 0x4db   : > { %858 = vrot.lane.b32.xlu1 %v1852_v53, %s1586_s24 }
 0x4dc   : > { %v643_v42 = vpop.permute.xlu1 %642 }
 0x4dd   : > { %1237 = vmatpush3.bf16.msra.mxu1 %v643_v42 }
 0x4de   : > { %1248 = vmatprep.subr.bf16.mxu1 %v1580_v18 }
 0x4df   : > { %966 = vrot.lane.b32.xlu1 %v1852_v53, %s1587_s14 }
 0x4e6   : > { %v1381_v43 = vpop.eup %1380 }
 0x4e7   : > { %v639_v44 = vmul.f32 %v1381_v43, %v1373_v24 }
 0x4e8   : > { %750 = vrot.lane.b32.xlu0 %v1852_v53, %s1588_s2 }
 0x4e9   : > { %v640_v45 = vpack.c.bf16 %v639_v44, %v639_v44 }
 0x4eb   : > { %1239 = vmatmul.mubr.msk.bf16.vlgmr.msra.gmra.mxu1 %vm628_vm4, %v640_v45 }
 0x4ec   : > { %1250 = vmatprep.mubr.msk.bf16.mxu1 %vm1581_vm1, %v1580_v18 }
 0x54b   : > { %v746_v46 = vpop.xlane.xlu0 %745 }
 0x54c   : > { %1382 = vrcp.f32 %v746_v46 }
 0x553   : > { %v854_v47 = vpop.xlane.xlu1 %853 }
 0x554   : > { %1384 = vrcp.f32 %v854_v47 }
 0x557   : > { %v859_v54 = vpop.permute.xlu1 %858 }
 0x559   : > { %v1383_v48 = vpop.eup %1382 }
 0x55a   : > { %v748_v50 = vmul.f32 %v1383_v48, %v1375_v34 }
 0x55b   : > { %v962_v49 = vpop.xlane.xlu0 %961  ;;  %v967_v58 = vpop.permute.xlu1 %966 }
 0x55c   : > { %1386 = vrcp.f32 %v962_v49  ;;  %v749_v52 = vpack.c.bf16 %v748_v50, %v748_v50 }
 0x55f   : > { %v751_v51 = vpop.permute.xlu0 %750 }
 0x560   : > { %1249 = vmatpush3.bf16.msra.mxu1 %v751_v51 }
 0x561   : > { %1260 = vmatprep.subr.bf16.mxu1 %v1580_v18  ;;  %v1385_v53 = vpop.eup %1384 }
 0x562   : > { %v856_v55 = vmul.f32 %v1385_v53, %v1377_v37 }
 0x563   : > { %1251 = vmatmul.mubr.msk.bf16.vlgmr.msra.gmra.mxu1 %vm628_vm4, %v749_v52 }
 0x564   : > { %1261 = vmatpush3.bf16.msra.mxu1 %v859_v54  ;;  %1262 = vmatprep.mubr.msk.bf16.mxu1 %vm1581_vm1, %v1580_v18  ;;  %v857_v56 = vpack.c.bf16 %v856_v55, %v856_v55 }
 0x565   : > { %1272 = vmatprep.subr.bf16.mxu1 %v1580_v18 }
 0x569   : > { %v1387_v57 = vpop.eup %1386 }
 0x56a   : > { %v964_v59 = vmul.f32 %v1387_v57, %v1379_v39 }
 0x56b   : > { %1263 = vmatmul.mubr.msk.bf16.vlgmr.msra.gmra.mxu1 %vm628_vm4, %v857_v56 }
 0x56c   : > { %1273 = vmatpush3.bf16.msra.mxu1 %v967_v58  ;;  %1274 = vmatprep.mubr.msk.bf16.mxu1 %vm1581_vm1, %v1580_v18  ;;  %v965_v60 = vpack.c.bf16 %v964_v59, %v964_v59 }
 0x573   : > { %1275 = vmatmul.mubr.msk.bf16.vlgmr.msra.gmra.mxu1 %vm628_vm4, %v965_v60 }
 0x5ab   : > { %v682_v61 = vpop.f32.mrf.mxu1 }
 0x5ad   : > { %v1240_v62 = vpop.f32.mrf.mxu1 }
 0x5af   : > { %v685_v63 = vpop.f32.mrf.mxu1 }
 0x5b1   : > { %v1241_v0 = vpop.f32.mrf.mxu1 }
 0x623   : > { %v790_v1 = vpop.f32.mrf.mxu1 }
 0x624   : > { %1013 = vrot.lane.b32.xlu1 %v790_v1, %s1589_s26 }
 0x625   : > { %v1252_v2 = vpop.f32.mrf.mxu1 }
 0x627   : > { %v793_v3 = vpop.f32.mrf.mxu1 }
 0x629   : > { %v1253_v4 = vpop.f32.mrf.mxu1 }
 0x62b   : > { %v898_v5 = vpop.f32.mrf.mxu1 }
 0x62c   : > { %1017 = vrot.lane.b32.xlu0 %v898_v5, %s1590_s13 }
 0x62d   : > { %v1264_v18 = vpop.f32.mrf.mxu1 }
 0x62f   : > { %v901_v6 = vpop.f32.mrf.mxu1 }
 0x631   : > { %v1265_v7 = vpop.f32.mrf.mxu1 }
 0x633   : > { %v1006_v8 = vpop.f32.mrf.mxu1 }
 0x634   : > { %1021 = vrot.lane.b32.xlu1 %v1006_v8, %s1591_s11 }
 0x635   : > { %v1276_v9 = vpop.f32.mrf.mxu1 }
 0x637   : > { %v1009_v10 = vpop.f32.mrf.mxu1 }
 0x639   : > { %v1277_v11 = vpop.f32.mrf.mxu1 }
 0x696   : > { %v1014_v12 = vpop.permute.xlu1 %1013 }
 0x697   : > { %v1024_v14 = vsel %vm582_vm3, %v682_v61, %v1014_v12 }
 0x69e   : > { %v1018_v13 = vpop.permute.xlu0 %1017 }
 0x69f   : > { %v1025_v15 = vsel %vm628_vm4, %v1024_v14, %v1018_v13 }
 0x6a6   : > { %v1022_v16 = vpop.permute.xlu1 %1021 }
 0x6a7   : > { %v1027_v17 = vsel %vm1026_vm5, %v1025_v15, %v1022_v16 }
 0x6a8   : > { %1028 = vst.msk [vmem:[%s386_s19] sm:$0xff] %vm394_vm0, %v1027_v17 }
 0x6a9   : > { %1509 = shalt.err (!%p1506_p4)
}
 0x6aa   : > { %s1510_s24 = scalar_lea.hbm %s1908_s18, 128  ;;  %s1514_s2 = scalar_lea.hbm %s1954_s8, 256 }
 0x6ab   : > { %p1511_p10 = scmp.ne.s32.totalorder %s1908_s18, %s1510_s24  ;;  %p1515_p11 = scmp.lt.s32.totalorder %s1908_s18, %s1954_s8 }
 0x6ac   : > { %p1516_p2 = scmp.lt.s32.totalorder %s1514_s2, %s1510_s24 }
 0x6ad   : > { %p1512_p0 = pnand %p1511_p10, %p1982_p7 }
 0x6ae   : > { %p1517_p6 = por %p1516_p2, %p1515_p11 }
 0x6af   : > { %p1513_p8 = pneg %p1512_p0 }
 0x6b1   : > { %p1518_p12 = pnand %p1517_p6, %p1513_p8 }
 0x6b3   : > { %1521 = shalt.err (!%p1518_p12)
}
 0x6b4   : > { %1290 = dma.vmem_to_hbm [thread:$0]  (%p1982_p7), %s1044_s17, 128, %s1908_s18, %s1030_s23  }
 0x6b5 PF: > { %s1055_s11 = sand.u32 1, %s1560_s27   ;;  %p1983_p9 = scmp.ne.s32.totalorder %s1966_s12, 0 }
 0x6b6   : > { %p1984_p13 = scmp.ge.s32.totalorder %s1572_s30, 2  ;;  %s1056_s29 = scalar_lea.sflag [#allocation4], %s1055_s11 }
 0x6b8   : > { %p1307_p5 = pnand %p1984_p13, %p1983_p9 }
 0x6ba   : > { %p1308_p1 = pneg %p1307_p5 }
 0x6bc   : > { %1555 = dma.done.wait (%p1308_p1), %s1056_s29, 128  }
 0x6bd   : > { %1557 = vsyncadd (%p1308_p1), %s1056_s29, 4294967168  ;;  %s1985_s30 = sld [smem:[#allocation17_spill]]  ;;  %s1988_s27 = smov %s1564_s28 }
 0x6be   : > { %s1986_s10 = sld [smem:[#allocation16_spill]] }
 0x6bf   : > { %s1987_s29 = sld [smem:[#allocation18_spill]] }
 0x6c3   : > { %p25_p3 = scmp.ge.s32.totalorder %s1985_s30, 4  }
 0x6c4   : > { %s1989_s28 = smov %s1986_s10 }
 0x6c5   :  { %27 = sbr.rel (!%p25_p3) target bundleno = 11 (0xb), region = 118 }
 0x6ca   :  { %1061 = vsyncpa [#allocation3], 1 }
 0x6cb   :  { %1063 = vsyncpa [#allocation3 + $0x1], 1 }
 0x6cc   :  { %1064 = vsyncpa [#allocation6], 1 }
 0x6cd   :  { %1066 = vsyncpa [#allocation6 + $0x1], 1 }
 0x6ce   :  { %1067 = vsyncpa [#allocation9], 1 }
 0x6cf   :  { %1068 = vsyncpa [#allocation4], 1 }
 0x6d0   :  { %1070 = vsyncpa [#allocation4 + $0x1], 1 }

// kernel: tpu_custom_call.1
= control target key start
LH: loop header
LB: loop body
LE: loop exit
PB: predicated region body
PF: predicated region fallthrough
CT: control target
= control target key end

     0   :  { %s1946_s0 = inlined_call_operand.hbm [shape: bf16[2,8,32], index: 0, kind: input, shape index: {}]   ;;  %s1947_s1 = inlined_call_operand.hbm [shape: bf16[2,8,32], index: 1, kind: input, shape index: {}]   ;;  %s1948_s2 = inlined_call_operand.hbm [shape: bf16[32,96], index: 2, kind: input, shape index: {}]   ;;  %s1949_s3 = inlined_call_operand.hbm [shape: bf16[32,64], index: 3, kind: input, shape index: {}]   ;;  %s1950_s4 = inlined_call_operand.vmem [shape: f32[1,32], index: 4, kind: input, shape index: {}]   ;;  %s1951_s5 = inlined_call_operand.vmem [shape: f32[1,32], index: 5, kind: input, shape index: {}]   ;;  %s1952_s6 = inlined_call_operand.vmem [shape: f32[1,32], index: 6, kind: input, shape index: {}]   ;;  %s1953_s7 = inlined_call_operand.vmem [shape: f32[1,32], index: 7, kind: input, shape index: {}]   ;;  %s1954_s8 = inlined_call_operand.hbm [shape: f32[2,8,32], index: 8, kind: output, shape index: {}]  }
   0x1   :  { %1962 = sst [smem:[#allocation19_spill]] %s1948_s2 }
   0x2   :  { %1963 = sst [smem:[#allocation20_spill]] %s1949_s3 }
   0x3   :  { %13 = vsyncpa [#allocation3], 0 }
   0x4   :  { %15 = vsyncpa [#allocation3 + $0x1], 0 }
   0x5   :  { %16 = vsyncpa [#allocation6], 0 }
   0x6   :  { %18 = vsyncpa [#allocation6 + $0x1], 0 }
   0x7   :  { %19 = vsyncpa [#allocation9], 0 }
   0x8   :  { %20 = vsyncpa [#allocation4], 0 }
   0x9   :  { %22 = vsyncpa [#allocation4 + $0x1], 0  ;;  %s1638_s27 = smov 0   ;;  %s1640_s28 = smov 0  }
   0xa   :  { %s1642_s29 = smov 0   ;;  %s1644_s30 = smov 0  }
   0xb LB: > { %1964 = sst [smem:[#allocation16_spill]] %s1568_s29  ;;  %s1659_s9 = sadd.s32 4294967295, %s1572_s30   ;;  %s1572_s30 = sphi %s1644_s30, %s1985_s30   ;;  %s1568_s29 = sphi %s1642_s29, %s1987_s29   ;;  %s1564_s28 = sphi %s1640_s28, %s1989_s28   ;;  %s1560_s27 = sphi %s1638_s27, %s1988_s27  }
   0xc   : > { %s1155_s10 = sadd.s32 4294967294, %s1572_s30   ;;  %p48_p0 = scmp.ne.s32.totalorder %s1564_s28, %s1560_s27 }
   0xd   : > { %p1955_p1 = scmp.eq.s32.totalorder %s1659_s9, 0  ;;  %p230_p3 = scmp.eq.s32.totalorder %s1155_s10, 1 }
   0xe   : > { %p1156_p5 = scmp.ge.s32.totalorder %s1572_s30, 1  ;;  %p237_p7 = scmp.lt.s32.totalorder %s1572_s30, 3 }
   0xf   : > { %p1668_p4 = por %p1955_p1, %p48_p0  ;;  %p1673_p6 = por %p230_p3, %p48_p0 }
  0x10   : > { %p1678_p8 = pnand %p1156_p5, %p237_p7  ;;  %s1574_s14 = smov [#allocation7]  }
  0x11   : > { %s1965_s11 = scalar_select %p1668_p4, 1, 0 }
  0x12   : > { %s1966_s12 = scalar_select %p1673_p6, 1, 0 }
  0x13   : > { %s1967_s13 = scalar_select %p1678_p8, 1, 0 }
  0x14   : > { %s249_s15 = sshll.u32 %s1574_s14, 4  ;;  %p1292_p9 = pneg %p1678_p8  ;;  %s250_s15 = int_to_ptr.vmem [resolvable:$true] %s249_s15 }
  0x15   : > { %s1575_s17 = smov [#allocation8]   ;;  %s1399_s19 = scalar_lea.vmem %s250_s15, 256 }
  0x16   : > { %p1687_p11 = pnand %p1292_p9, %p1955_p1  ;;  %s262_s18 = sshll.u32 %s1575_s17, 4  ;;  %s263_s18 = int_to_ptr.vmem [resolvable:$true] %s262_s18 }
  0x17   : > { %p1400_p13 = scmp.ne.s32.totalorder %s250_s15, %s1399_s19  ;;  %p1407_p5 = scmp.lt.s32.totalorder %s250_s15, %s250_s15 }
  0x18   : > { %p1390_p12 = pneg %p1687_p11  ;;  %p1408_p7 = scmp.lt.s32.totalorder %s1399_s19, %s1399_s19 }
  0x1a   : > { %p1402_p0 = pnand %p1400_p13, %p1390_p12  ;;  %p1409_p10 = por %p1408_p7, %p1407_p5 }
  0x1c   : > { %p1403_p3 = pneg %p1402_p0 }
  0x1e   : > { %p1410_p9 = pnand %p1409_p10, %p1403_p3 }
  0x20   : > { %1413 = shalt.err (!%p1410_p9)
}
  0x21   : > { %s1576_s20 = smov 64   ;;  %s1577_s21 = smov 4  }
  0x22   : > { %s1969_s2 = sld [smem:[#allocation19_spill]]  ;;  %s1425_s24 = scalar_lea.vmem %s263_s18, 256 }
  0x23   : > { %p1426_p1 = scmp.ne.s32.totalorder %s263_s18, %s1425_s24  ;;  %p1433_p2 = scmp.lt.s32.totalorder %s263_s18, %s263_s18 }
  0x24   : > { %p1434_p6 = scmp.lt.s32.totalorder %s1425_s24, %s1425_s24 }
  0x25   : > { %p1428_p13 = pnand %p1426_p1, %p1390_p12 }
  0x26   : > { %p1435_p5 = por %p1434_p6, %p1433_p2 }
  0x27   : > { %p1429_p0 = pneg %p1428_p13 }
  0x28   : > { %1295 = dma.hbm_to_vmem [thread:$0]  (!%p1687_p11), %s1969_s2, 256, %s250_s15, [#allocation6], %s1576_s20, %s1576_s20, %s1577_s21  }
  0x29   : > { %p1436_p10 = pnand %p1435_p5, %p1429_p0 }
  0x2b   : > { %1439 = shalt.err (!%p1436_p10)
}
  0x2c   : > { %s1970_s3 = sld [smem:[#allocation20_spill]]  ;;  %s1710_s10 = sadd.s32 1, %s1572_s30  }
  0x2d   : > { %1971 = sst [smem:[#allocation17_spill]] %s1710_s10  ;;  %s35_s14 = sadd.s32 1, %s1568_s29 }
  0x2e   : > { %s32_s15 = ssub.s32 %s1572_s30, %s1710_s10  ;;  %p42_p1 = scmp.ne.s32.totalorder %s1568_s29, %s1564_s28 }
  0x2f   : > { %p33_p2 = scmp.eq.s32.totalorder %s32_s15, 0  ;;  %p43_p6 = scmp.eq.s32.totalorder %s1572_s30, 0 }
  0x30   : > { %p1972_p12 = scmp.eq.s32.totalorder %s1659_s9, 1  ;;  %p1312_p7 = scmp.lt.s32.totalorder %s1572_s30, 2 }
  0x31   : > { %s1726_s17 = scalar_select %p33_p2, %s1568_s29, %s35_s14  }
  0x32   : > { %1298 = dma.hbm_to_vmem [thread:$0]  (!%p1687_p11), %s1970_s3, 256, %s263_s18, [#allocation9], %s1576_s20, %s1576_s20, %s1577_s21  }
  0x33   : > { %p1720_p3 = por %p1972_p12, %p42_p1  ;;  %1974 = sst [smem:[#allocation18_spill]] %s1726_s17 }
  0x34   : > { %p44_p9 = por %p43_p6, %p42_p1  ;;  %s288_s19 = sand.u32 1, %s1568_s29  }
  0x35   : > { %s1973_s16 = scalar_select %p1720_p3, 1, 0 }
  0x36   : > { %s1729_s18 = sshll.u32 %s288_s19, 2  ;;  %s1161_s20 = sshll.u32 %s1572_s30, 6 }
  0x37   : > { %s1735_s23 = scalar_lea.hbm %s1946_s0, %s1161_s20  ;;  %s292_s24 = scalar_lea.vmem [#allocation2], %s1729_s18 }
  0x38   : > { %s299_s25 = sshll.u32 %s292_s24, 4  ;;  %p1740_p11 = pnand %p1312_p7, %p44_p9  ;;  %s1738_s25 = int_to_ptr.vmem [resolvable:$true] %s299_s25 }
  0x39   : > { %s1747_s2 = scalar_lea.hbm %s1947_s1, %s1161_s20  ;;  %s306_s21 = sand.u32 1, %s1572_s30  }
  0x3a   : > { %s289_s22 = scalar_lea.sflag [#allocation3], %s288_s19  ;;  %s1440_s3 = scalar_lea.hbm %s1735_s23, 64 }
  0x3b   : > { %p1441_p13 = scmp.ne.s32.totalorder %s1735_s23, %s1440_s3  ;;  %p1442_p0 = pneg %p1740_p11 }
  0x3c   : > { %s1445_s29 = scalar_lea.hbm %s1946_s0, 128  ;;  %p1446_p1 = scmp.lt.s32.totalorder %s1735_s23, %s1946_s0 }
  0x3d   : > { %p1443_p5 = pnand %p1442_p0, %p1441_p13  ;;  %p1447_p2 = scmp.lt.s32.totalorder %s1445_s29, %s1440_s3 }
  0x3f   : > { %p1444_p10 = pneg %p1443_p5  ;;  %p1448_p6 = por %p1447_p2, %p1446_p1 }
  0x41   : > { %p1449_p12 = pnand %p1448_p6, %p1444_p10 }
  0x43   : > { %1452 = shalt.err (!%p1449_p12)
}
  0x44   : > { %s1453_s19 = scalar_lea.vmem %s1738_s25, 64  ;;  %s1578_s17 = smov [#allocation2]  }
  0x45   : > { %p1454_p7 = scmp.ne.s32.totalorder %s1738_s25, %s1453_s19  ;;  %s1458_s20 = sshll.u32 %s1578_s17, 4  ;;  %s1459_s20 = int_to_ptr.vmem [resolvable:$false] %s1458_s20 }
  0x46   : > { %s1460_s15 = scalar_lea.vmem %s1459_s20, 128  ;;  %p1461_p5 = scmp.lt.s32.totalorder %s1738_s25, %s1459_s20 }
  0x47   : > { %p1456_p9 = pnand %p1454_p7, %p1442_p0  ;;  %p1462_p3 = scmp.lt.s32.totalorder %s1460_s15, %s1453_s19 }
  0x49   : > { %p1457_p13 = pneg %p1456_p9  ;;  %p1463_p4 = por %p1462_p3, %p1461_p5 }
  0x4b   : > { %p1464_p1 = pnand %p1463_p4, %p1457_p13 }
  0x4d   : > { %1467 = shalt.err (!%p1464_p1)
}
  0x4e   : > { %1302 = dma.hbm_to_vmem [thread:$0]  (!%p1740_p11), %s1735_s23, 64, %s1738_s25, %s289_s22  }
  0x4f   : > { %s310_s3 = scalar_lea.vmem [#allocation5], %s1729_s18  ;;  %s307_s10 = scalar_lea.sflag [#allocation6], %s306_s21 }
  0x50   : > { %s317_s29 = sshll.u32 %s310_s3, 4  ;;  %s1468_s24 = scalar_lea.hbm %s1747_s2, 64  ;;  %s318_s29 = int_to_ptr.vmem [resolvable:$true] %s317_s29 }
  0x51   : > { %p1469_p3 = scmp.ne.s32.totalorder %s1747_s2, %s1468_s24  ;;  %s1473_s17 = scalar_lea.hbm %s1947_s1, 128 }
  0x52   : > { %p1474_p2 = scmp.lt.s32.totalorder %s1747_s2, %s1947_s1  ;;  %p1475_p6 = scmp.lt.s32.totalorder %s1473_s17, %s1468_s24 }
  0x53   : > { %p1471_p4 = pnand %p1469_p3, %p1442_p0 }
  0x54   : > { %p1476_p12 = por %p1475_p6, %p1474_p2 }
  0x55   : > { %p1472_p10 = pneg %p1471_p4 }
  0x57   : > { %p1477_p7 = pnand %p1476_p12, %p1472_p10 }
  0x59   : > { %1480 = shalt.err (!%p1477_p7)
}
  0x5a   : > { %s1481_s18 = scalar_lea.vmem %s318_s29, 64  ;;  %s1579_s23 = smov [#allocation5]  }
  0x5b   : > { %p1482_p9 = scmp.ne.s32.totalorder %s318_s29, %s1481_s18  ;;  %s1486_s25 = sshll.u32 %s1579_s23, 4  ;;  %s1487_s25 = int_to_ptr.vmem [resolvable:$false] %s1486_s25 }
  0x5c   : > { %s1488_s21 = scalar_lea.vmem %s1487_s25, 128  ;;  %p1489_p1 = scmp.lt.s32.totalorder %s318_s29, %s1487_s25 }
  0x5d   : > { %p1484_p13 = pnand %p1482_p9, %p1442_p0  ;;  %p1490_p3 = scmp.lt.s32.totalorder %s1488_s21, %s1481_s18 }
  0x5f   : > { %p1485_p5 = pneg %p1484_p13  ;;  %p1491_p4 = por %p1490_p3, %p1489_p1 }
  0x61   : > { %p1492_p8 = pnand %p1491_p4, %p1485_p5 }
  0x63   : > { %1495 = shalt.err (!%p1492_p8)
}
  0x64   : > { %1305 = dma.hbm_to_vmem [thread:$0]  (!%p1740_p11), %s1747_s2, 64, %s318_s29, %s307_s10  }
  0x65   : > { %p1976_p10 = scmp.ne.s32.totalorder %s1967_s13, 0 }
  0x66   : > { %s1798_s22 = sand.u32 (!%p1976_p10), 1, %s1564_s28   ;;  %p1977_p0 = scmp.ne.s32.totalorder (!%p1976_p10), %s1965_s11, 0 }
  0x67   : > { %326 = sbr.rel (%p1976_p10) target bundleno = 1717 (0x6b5), region = 52  ;;  %s1165_s3 = sshll.u32 (!%p1976_p10), %s1798_s22, 2 }
  0x68   : > { %s329_s24 = scalar_lea.sflag (!%p1976_p10), [#allocation3], %s1798_s22  ;;  %s332_s14 = scalar_lea.vmem (!%p1976_p10), [#allocation2], %s1165_s3 }
  0x6c   : > { %1539 = dma.done.wait (%p1977_p0), %s329_s24, 64  }
  0x6d   : > { %1541 = vsyncadd (%p1977_p0), %s329_s24, 4294967232  ;;  %s337_s2 = sand.u32 1, %s1659_s9   ;;  %s341_s13 = scalar_lea.vmem [#allocation5], %s1165_s3 }
  0x6e   : > { %s338_s26 = scalar_lea.sflag [#allocation6], %s337_s2 }
  0x6f   : > { %1543 = dma.done.wait (%p1977_p0), %s338_s26, 64  }
  0x70   : > { %1545 = vsyncadd (%p1977_p0), %s338_s26, 4294967232  ;;  %p1978_p8 = scmp.eq.s32.totalorder %s1659_s9, 0 }
  0x72   : > { %1547 = dma.done.wait (%p1978_p8), [#allocation6], 256   ;;  %p1979_p11 = pmov %p1978_p8 }
  0x73   : > { %p1980_p2 = pmov %p1978_p8 }
  0x74   : > { %1549 = vsyncadd (%p1979_p11), [#allocation6], 4294967040 }
  0x75   : > { %1551 = dma.done.wait (%p1980_p2), [#allocation9], 256   ;;  %p1981_p6 = pmov %p1980_p2 }
  0x76   : > { %vm394_vm0 = vcmask 261120   ;;  %v390_v0 = vld [vmem:[%s341_s13] sm:$0xf]  ;;  %v388_v1 = vld [vmem:[%s332_s14] sm:$0xf]  ;;  %v1364_v16 = vld [vmem:[#allocation7 + $0x8] sm:$0xff]  }
  0x77   : > { %1553 = vsyncadd (%p1981_p6), [#allocation9], 4294967040  ;;  %v391_v2 = vunpack.c.l.bf16 %v390_v0  ;;  %v389_v3 = vunpack.c.l.bf16 %v388_v1  ;;  %v1366_v17 = vld [vmem:[#allocation8 + $0x8] sm:$0xff]   ;;  %v1580_v18 = vmov 0.0   ;;  %v1365_v19 = vld [vmem:[#allocation7] sm:$0xff]   ;;  %vm1581_vm1 = vmmov 0  }
  0x78   : > { %1214 = vmatprep.subr.bf16.mxu0 %v1580_v18  ;;  %1222 = vmatprep.subr.bf16.mxu1 %v1580_v18  ;;  %v1367_v20 = vld [vmem:[#allocation8] sm:$0xff]   ;;  %s1582_s23 = smov 96   ;;  %s1583_s25 = smov 112   ;;  %vm578_vm2 = vcmask 1043456   ;;  %vm582_vm3 = vcmask 64512   ;;  %vm628_vm4 = vcmask 130048  }
  0x79   : > { %v426_v4 = vsel %vm394_vm0, %v391_v2, 0.0  ;;  %v395_v5 = vsel %vm394_vm0, %v389_v3, 0.0  ;;  %1215 = vmatpush3.bf16.msra.mxu0 %v1364_v16  ;;  %1223 = vmatpush3.bf16.msra.mxu1 %v1366_v17  ;;  %v1172_v28 = vld [vmem:[%s1952_s6] ss:$0 sm:$0xff]  ;;  %s1584_s21 = smov 104   ;;  %s1585_s3 = smov 120  }
  0x7a   : > { %427 = vadd.xlane.f32.xlu0 %v426_v4  ;;  %1216 = vmatprep.subr.bf16.mxu0 %v1580_v18  ;;  %v1173_v30 = vld [vmem:[%s1953_s7] ss:$0 sm:$0xff]  ;;  %s1586_s24 = smov 80   ;;  %s1587_s14 = smov 72   ;;  %vm1026_vm5 = vcmask 195584  }
  0x7b   : > { %1218 = vmatprep.mubr.msk.bf16.mxu0 %vm1581_vm1, %v1580_v18  ;;  %1224 = vmatprep.subr.bf16.mxu1 %v1580_v18  ;;  %v1170_v33 = vld [vmem:[%s1950_s4] ss:$0 sm:$0xff]  ;;  %s1588_s2 = smov 88   ;;  %s1589_s26 = smov 8  }
  0x7c   : > { %1226 = vmatprep.mubr.msk.bf16.mxu1 %vm1581_vm1, %v1580_v18  ;;  %v1171_v36 = vld [vmem:[%s1951_s5] ss:$0 sm:$0xff]  ;;  %s1590_s13 = smov 16   ;;  %s1591_s11 = smov 24  }
  0x7d   : > { %1217 = vmatpush3.bf16.msra.mxu0 %v1365_v19  ;;  %1225 = vmatpush3.bf16.msra.mxu1 %v1367_v20  ;;  %s1169_s29 = sshll.u32 %s1798_s22, 3  ;;  %s1189_s10 = sshll.u32 %s1659_s9, 7 }
  0x7e   : > { %396 = vadd.xlane.f32.xlu0 %v395_v5  ;;  %1230 = vmatprep.subr.bf16.mxu0 %v1580_v18  ;;  %s386_s19 = scalar_lea.vmem [#allocation10], %s1169_s29  ;;  %s1908_s18 = scalar_lea.hbm %s1954_s8, %s1189_s10 }
  0x7f   : > { %1236 = vmatprep.subr.bf16.mxu1 %v1580_v18  ;;  %s1043_s17 = sshll.u32 %s386_s19, 4  ;;  %p1982_p7 = scmp.ne.s32.totalorder %s1973_s16, 0  ;;  %s1044_s17 = int_to_ptr.vmem [resolvable:$true] %s1043_s17 }
  0x80   : > { %s1592_s9 = smov [#allocation10]  }
 0x103   : > { %v428_v6 = vpop.xlane.xlu0 %427 }
 0x104   : > { %v429_v7 = vmul.f32 0.03125, %v428_v6 }
 0x106   : > { %v430_v8 = vsub.f32 %v391_v2, %v429_v7 }
 0x107   : > { %v397_v9 = vpop.xlane.xlu0 %396 }
 0x108   : > { %v399_v10 = vmul.f32 0.03125, %v397_v9  ;;  %v431_v11 = vmul.f32 %v430_v8, %v430_v8 }
 0x10a   : > { %v400_v12 = vsub.f32 %v389_v3, %v399_v10  ;;  %v432_v13 = vsel %vm394_vm0, %v431_v11, 0.0 }
 0x10b   : > { %433 = vadd.xlane.f32.xlu1 %v432_v13 }
 0x10c   : > { %v401_v14 = vmul.f32 %v400_v12, %v400_v12 }
 0x10e   : > { %v402_v15 = vsel %vm394_vm0, %v401_v14, 0.0 }
 0x10f   : > { %403 = vadd.xlane.f32.xlu1 %v402_v15 }
 0x194   : > { %v434_v21 = vpop.xlane.xlu1 %433 }
 0x195   : > { %v435_v22 = vmul.f32 0.03125, %v434_v21 }
 0x197   : > { %v436_v23 = vadd.f32 1e-05, %v435_v22 }
 0x198   : > { %v404_v24 = vpop.xlane.xlu1 %403 }
 0x199   : > { %1368 = vrsqrt.f32 %v436_v23  ;;  %v405_v25 = vmul.f32 0.03125, %v404_v24 }
 0x19b   : > { %v406_v26 = vadd.f32 1e-05, %v405_v25 }
 0x19d   : > { %1370 = vrsqrt.f32 %v406_v26 }
 0x1a6   : > { %v1369_v27 = vpop.eup %1368 }
 0x1a7   : > { %v438_v29 = vmul.f32 %v1369_v27, %v430_v8 }
 0x1a9   : > { %v445_v31 = vmul.f32 %v1172_v28, %v438_v29 }
 0x1aa   : > { %v1371_v32 = vpop.eup %1370 }
 0x1ab   : > { %v452_v34 = vadd.f32 %v1173_v30, %v445_v31  ;;  %v408_v35 = vmul.f32 %v1371_v32, %v400_v12 }
 0x1ad   : > { %v453_v37 = vpack.c.bf16 %v452_v34, %v452_v34  ;;  %v415_v38 = vmul.f32 %v1170_v33, %v408_v35 }
 0x1af   : > { %1219 = vmatmul.mubr.msk.bf16.vlgmr.msra.gmra.mxu0 %vm394_vm0, %v453_v37  ;;  %v422_v39 = vadd.f32 %v1171_v36, %v415_v38 }
 0x1b0   : > { %1232 = vmatprep.mubr.msk.bf16.mxu0 %vm1581_vm1, %v1580_v18 }
 0x1b1   : > { %v423_v40 = vpack.c.bf16 %v422_v39, %v422_v39 }
 0x1b3   : > { %1227 = vmatmul.mubr.msk.bf16.vlgmr.msra.gmra.mxu1 %vm394_vm0, %v423_v40 }
 0x1b4   : > { %1238 = vmatprep.mubr.msk.bf16.mxu1 %vm1581_vm1, %v1580_v18 }
 0x26f   : > { %v507_v41 = vpop.f32.mrf.mxu0 }
 0x270   : > { %v572_v42 = vpack.c.bf16 %v507_v41, %v507_v41 }
 0x271   : > { %v1220_v43 = vpop.f32.mrf.mxu0 }
 0x272   : > { %v575_v44 = vrot.slane %v572_v42, 4 }
 0x273   : > { %v510_v45 = vpop.f32.mrf.mxu0  ;;  %v566_v46 = vpop.f32.mrf.mxu1 }
 0x274   : > { %576 = vrot.lane.b32.xlu0 %v575_v44, %s1582_s23  ;;  %v573_v51 = vpack.c.bf16 %v566_v46, %v566_v46 }
 0x275   : > { %v1221_v47 = vpop.f32.mrf.mxu0  ;;  %v1228_v48 = vpop.f32.mrf.mxu1 }
 0x277   : > { %v569_v49 = vpop.f32.mrf.mxu1 }
 0x278   : > { %796 = vrot.lane.b32.xlu0 %v572_v42, %s1583_s25 }
 0x279   : > { %v1229_v50 = vpop.f32.mrf.mxu1 }
 0x27c   : > { %904 = vrot.lane.b32.xlu0 %v572_v42, %s1584_s21 }
 0x2e6   : > { %v577_v52 = vpop.permute.xlu0 %576 }
 0x2e7   : > { %v1852_v53 = vsel %vm578_vm2, %v573_v51, %v577_v52 }
 0x2e8   : > { %690 = vrot.lane.b32.xlu1 %v1852_v53, %s1585_s3  ;;  %v586_v54 = vsel %vm582_vm3, %v1852_v53, 0 }
 0x2e9   : > { %1231 = vmatpush3.bf16.xpose.msra.mxu0 %v586_v54 }
 0x2ea   : > { %1242 = vmatprep.subr.bf16.mxu0 %v1580_v18  ;;  %v797_v61 = vpop.permute.xlu0 %796 }
 0x2ec   : > { %688 = vrot.lane.b32.xlu1 %v572_v42, %s1585_s3 }
 0x2ee   : > { %v905_v63 = vpop.permute.xlu0 %904 }
 0x2f0   : > { %798 = vrot.lane.b32.xlu1 %v1852_v53, %s1583_s25  ;;  %1233 = vmatmul.mubr.msk.bf16.vlgmr.msra.gmra.mxu0 %vm582_vm3, %v572_v42  ;;  %s1496_s25 = scalar_lea.vmem %s1044_s17, 128 }
 0x2f1   : > { %1244 = vmatprep.mubr.msk.bf16.mxu0 %vm1581_vm1, %v1580_v18  ;;  %p1497_p12 = scmp.ne.s32.totalorder %s1044_s17, %s1496_s25 }
 0x2f3   : > { %p1498_p9 = pnand %p1497_p12, %p1982_p7 }
 0x2f4   : > { %906 = vrot.lane.b32.xlu1 %v1852_v53, %s1584_s21  ;;  %s1500_s21 = sshll.u32 %s1592_s9, 4  ;;  %s1501_s21 = int_to_ptr.vmem [resolvable:$false] %s1500_s21 }
 0x2f5   : > { %p1499_p13 = pneg %p1498_p9  ;;  %s1502_s3 = scalar_lea.vmem %s1501_s21, 256 }
 0x2f6   : > { %p1503_p5 = scmp.lt.s32.totalorder %s1044_s17, %s1501_s21  ;;  %p1504_p1 = scmp.lt.s32.totalorder %s1502_s3, %s1496_s25 }
 0x2f8   : > { %p1505_p3 = por %p1504_p1, %p1503_p5 }
 0x2fa   : > { %p1506_p4 = pnand %p1505_p3, %p1499_p13 }
 0x35a   : > { %v691_v55 = vpop.permute.xlu1 %690 }
 0x35b   : > { %v696_v56 = vsel %vm582_vm3, %v691_v55, 0 }
 0x35c   : > { %1243 = vmatpush3.bf16.xpose.msra.mxu0 %v696_v56 }
 0x35d   : > { %1254 = vmatprep.subr.bf16.mxu0 %v1580_v18 }
 0x35e   : > { %v689_v57 = vpop.permute.xlu1 %688 }
 0x362   : > { %v799_v58 = vpop.permute.xlu1 %798 }
 0x363   : > { %v804_v59 = vsel %vm582_vm3, %v799_v58, 0  ;;  %1245 = vmatmul.mubr.msk.bf16.vlgmr.msra.gmra.mxu0 %vm582_vm3, %v689_v57 }
 0x364   : > { %1255 = vmatpush3.bf16.xpose.msra.mxu0 %v804_v59  ;;  %1256 = vmatprep.mubr.msk.bf16.mxu0 %vm1581_vm1, %v1580_v18 }
 0x365   : > { %1266 = vmatprep.subr.bf16.mxu0 %v1580_v18 }
 0x366   : > { %v907_v60 = vpop.permute.xlu1 %906 }
 0x367   : > { %v912_v62 = vsel %vm582_vm3, %v907_v60, 0 }
 0x36b   : > { %1257 = vmatmul.mubr.msk.bf16.vlgmr.msra.gmra.mxu0 %vm582_vm3, %v797_v61 }
 0x36c   : > { %1267 = vmatpush3.bf16.xpose.msra.mxu0 %v912_v62  ;;  %1268 = vmatprep.mubr.msk.bf16.mxu0 %vm1581_vm1, %v1580_v18 }
 0x373   : > { %1269 = vmatmul.mubr.msk.bf16.vlgmr.msra.gmra.mxu0 %vm582_vm3, %v905_v63 }
 0x3b0   : > { %v622_v0 = vpop.f32.mrf.mxu0 }
 0x3b1   : > { %v629_v1 = vsel %vm628_vm4, %v622_v0, -inf }
 0x3b2   : > { %630 = vmax.xlane.f32.xlu1 %v629_v1  ;;  %v1234_v2 = vpop.f32.mrf.mxu0 }
 0x3b4   : > { %v625_v3 = vpop.f32.mrf.mxu0 }
 0x3b6   : > { %v1235_v4 = vpop.f32.mrf.mxu0 }
 0x423   : > { %v732_v5 = vpop.f32.mrf.mxu0 }
 0x424   : > { %v738_v6 = vsel %vm628_vm4, %v732_v5, -inf }
 0x425   : > { %739 = vmax.xlane.f32.xlu0 %v738_v6  ;;  %v1246_v7 = vpop.f32.mrf.mxu0 }
 0x427   : > { %v735_v8 = vpop.f32.mrf.mxu0 }
 0x429   : > { %v1247_v9 = vpop.f32.mrf.mxu0 }
 0x42b   : > { %v840_v10 = vpop.f32.mrf.mxu0 }
 0x42c   : > { %v846_v11 = vsel %vm628_vm4, %v840_v10, -inf }
 0x42d   : > { %847 = vmax.xlane.f32.xlu0 %v846_v11  ;;  %v1258_v12 = vpop.f32.mrf.mxu0 }
 0x42f   : > { %v843_v13 = vpop.f32.mrf.mxu0 }
 0x431   : > { %v1259_v14 = vpop.f32.mrf.mxu0 }
 0x433   : > { %v948_v15 = vpop.f32.mrf.mxu0 }
 0x434   : > { %v954_v16 = vsel %vm628_vm4, %v948_v15, -inf }
 0x435   : > { %955 = vmax.xlane.f32.xlu0 %v954_v16  ;;  %v1270_v17 = vpop.f32.mrf.mxu0 }
 0x437   : > { %v951_v19 = vpop.f32.mrf.mxu0 }
 0x439   : > { %v1271_v20 = vpop.f32.mrf.mxu0 }
 0x43b   : > { %v631_v21 = vpop.xlane.xlu1 %630 }
 0x43c   : > { %v632_v22 = vsub.f32 %v622_v0, %v631_v21 }
 0x43e   : > { %v633_v23 = vmul.f32 1.442695, %v632_v22 }
 0x440   : > { %1372 = vpow2.f32 %v633_v23 }
 0x44d   : > { %v1373_v24 = vpop.eup %1372 }
 0x44e   : > { %v635_v25 = vsel %vm628_vm4, %v1373_v24, 0.0 }
 0x44f   : > { %636 = vadd.xlane.f32.xlu1 %v635_v25 }
 0x460   : > { %642 = vrot.lane.b32.xlu1 %v1852_v53, %s1582_s23  ;;  %s1030_s23 = scalar_lea.sflag [#allocation4], %s1798_s22 }
 0x4ae   : > { %v740_v26 = vpop.xlane.xlu0 %739 }
 0x4af   : > { %v741_v27 = vsub.f32 %v732_v5, %v740_v26 }
 0x4b1   : > { %v742_v28 = vmul.f32 1.442695, %v741_v27 }
 0x4b3   : > { %1374 = vpow2.f32 %v742_v28 }
 0x4b6   : > { %v848_v29 = vpop.xlane.xlu0 %847 }
 0x4b7   : > { %v849_v30 = vsub.f32 %v840_v10, %v848_v29 }
 0x4b9   : > { %v850_v31 = vmul.f32 1.442695, %v849_v30 }
 0x4bb   : > { %1376 = vpow2.f32 %v850_v31 }
 0x4be   : > { %v956_v32 = vpop.xlane.xlu0 %955 }
 0x4bf   : > { %v957_v33 = vsub.f32 %v948_v15, %v956_v32 }
 0x4c0   : > { %v1375_v34 = vpop.eup %1374 }
 0x4c1   : > { %v958_v35 = vmul.f32 1.442695, %v957_v33  ;;  %v744_v36 = vsel %vm628_vm4, %v1375_v34, 0.0 }
 0x4c2   : > { %745 = vadd.xlane.f32.xlu0 %v744_v36 }
 0x4c3   : > { %1378 = vpow2.f32 %v958_v35 }
 0x4c8   : > { %v1377_v37 = vpop.eup %1376 }
 0x4c9   : > { %v852_v38 = vsel %vm628_vm4, %v1377_v37, 0.0 }
 0x4ca   : > { %853 = vadd.xlane.f32.xlu1 %v852_v38 }
 0x4d0   : > { %v1379_v39 = vpop.eup %1378 }
 0x4d1   : > { %v960_v40 = vsel %vm628_vm4, %v1379_v39, 0.0 }
 0x4d2   : > { %961 = vadd.xlane.f32.xlu0 %v960_v40 }
 0x4d8   : > { %v637_v41 = vpop.xlane.xlu1 %636 }
 0x4d9   : > { %1380 = vrcp.f32 %v637_v41 }
 0x4db   : > { %858 = vrot.lane.b32.xlu1 %v1852_v53, %s1586_s24 }
 0x4dc   : > { %v643_v42 = vpop.permute.xlu1 %642 }
 0x4dd   : > { %1237 = vmatpush3.bf16.msra.mxu1 %v643_v42 }
 0x4de   : > { %1248 = vmatprep.subr.bf16.mxu1 %v1580_v18 }
 0x4df   : > { %966 = vrot.lane.b32.xlu1 %v1852_v53, %s1587_s14 }
 0x4e6   : > { %v1381_v43 = vpop.eup %1380 }
 0x4e7   : > { %v639_v44 = vmul.f32 %v1381_v43, %v1373_v24 }
 0x4e8   : > { %750 = vrot.lane.b32.xlu0 %v1852_v53, %s1588_s2 }
 0x4e9   : > { %v640_v45 = vpack.c.bf16 %v639_v44, %v639_v44 }
 0x4eb   : > { %1239 = vmatmul.mubr.msk.bf16.vlgmr.msra.gmra.mxu1 %vm628_vm4, %v640_v45 }
 0x4ec   : > { %1250 = vmatprep.mubr.msk.bf16.mxu1 %vm1581_vm1, %v1580_v18 }
 0x54b   : > { %v746_v46 = vpop.xlane.xlu0 %745 }
 0x54c   : > { %1382 = vrcp.f32 %v746_v46 }
 0x553   : > { %v854_v47 = vpop.xlane.xlu1 %853 }
 0x554   : > { %1384 = vrcp.f32 %v854_v47 }
 0x557   : > { %v859_v54 = vpop.permute.xlu1 %858 }
 0x559   : > { %v1383_v48 = vpop.eup %1382 }
 0x55a   : > { %v748_v50 = vmul.f32 %v1383_v48, %v1375_v34 }
 0x55b   : > { %v962_v49 = vpop.xlane.xlu0 %961  ;;  %v967_v58 = vpop.permute.xlu1 %966 }
 0x55c   : > { %1386 = vrcp.f32 %v962_v49  ;;  %v749_v52 = vpack.c.bf16 %v748_v50, %v748_v50 }
 0x55f   : > { %v751_v51 = vpop.permute.xlu0 %750 }
 0x560   : > { %1249 = vmatpush3.bf16.msra.mxu1 %v751_v51 }
 0x561   : > { %1260 = vmatprep.subr.bf16.mxu1 %v1580_v18  ;;  %v1385_v53 = vpop.eup %1384 }
 0x562   : > { %v856_v55 = vmul.f32 %v1385_v53, %v1377_v37 }
 0x563   : > { %1251 = vmatmul.mubr.msk.bf16.vlgmr.msra.gmra.mxu1 %vm628_vm4, %v749_v52 }
 0x564   : > { %1261 = vmatpush3.bf16.msra.mxu1 %v859_v54  ;;  %1262 = vmatprep.mubr.msk.bf16.mxu1 %vm1581_vm1, %v1580_v18  ;;  %v857_v56 = vpack.c.bf16 %v856_v55, %v856_v55 }
 0x565   : > { %1272 = vmatprep.subr.bf16.mxu1 %v1580_v18 }
 0x569   : > { %v1387_v57 = vpop.eup %1386 }
 0x56a   : > { %v964_v59 = vmul.f32 %v1387_v57, %v1379_v39 }
 0x56b   : > { %1263 = vmatmul.mubr.msk.bf16.vlgmr.msra.gmra.mxu1 %vm628_vm4, %v857_v56 }
 0x56c   : > { %1273 = vmatpush3.bf16.msra.mxu1 %v967_v58  ;;  %1274 = vmatprep.mubr.msk.bf16.mxu1 %vm1581_vm1, %v1580_v18  ;;  %v965_v60 = vpack.c.bf16 %v964_v59, %v964_v59 }
 0x573   : > { %1275 = vmatmul.mubr.msk.bf16.vlgmr.msra.gmra.mxu1 %vm628_vm4, %v965_v60 }
 0x5ab   : > { %v682_v61 = vpop.f32.mrf.mxu1 }
 0x5ad   : > { %v1240_v62 = vpop.f32.mrf.mxu1 }
 0x5af   : > { %v685_v63 = vpop.f32.mrf.mxu1 }
 0x5b1   : > { %v1241_v0 = vpop.f32.mrf.mxu1 }
 0x623   : > { %v790_v1 = vpop.f32.mrf.mxu1 }
 0x624   : > { %1013 = vrot.lane.b32.xlu1 %v790_v1, %s1589_s26 }
 0x625   : > { %v1252_v2 = vpop.f32.mrf.mxu1 }
 0x627   : > { %v793_v3 = vpop.f32.mrf.mxu1 }
 0x629   : > { %v1253_v4 = vpop.f32.mrf.mxu1 }
 0x62b   : > { %v898_v5 = vpop.f32.mrf.mxu1 }
 0x62c   : > { %1017 = vrot.lane.b32.xlu0 %v898_v5, %s1590_s13 }
 0x62d   : > { %v1264_v18 = vpop.f32.mrf.mxu1 }
 0x62f   : > { %v901_v6 = vpop.f32.mrf.mxu1 }
 0x631   : > { %v1265_v7 = vpop.f32.mrf.mxu1 }
 0x633   : > { %v1006_v8 = vpop.f32.mrf.mxu1 }
 0x634   : > { %1021 = vrot.lane.b32.xlu1 %v1006_v8, %s1591_s11 }
 0x635   : > { %v1276_v9 = vpop.f32.mrf.mxu1 }
 0x637   : > { %v1009_v10 = vpop.f32.mrf.mxu1 }
 0x639   : > { %v1277_v11 = vpop.f32.mrf.mxu1 }
 0x696   : > { %v1014_v12 = vpop.permute.xlu1 %1013 }
 0x697   : > { %v1024_v14 = vsel %vm582_vm3, %v682_v61, %v1014_v12 }
 0x69e   : > { %v1018_v13 = vpop.permute.xlu0 %1017 }
 0x69f   : > { %v1025_v15 = vsel %vm628_vm4, %v1024_v14, %v1018_v13 }
 0x6a6   : > { %v1022_v16 = vpop.permute.xlu1 %1021 }
 0x6a7   : > { %v1027_v17 = vsel %vm1026_vm5, %v1025_v15, %v1022_v16 }
 0x6a8   : > { %1028 = vst.msk [vmem:[%s386_s19] sm:$0xff] %vm394_vm0, %v1027_v17 }
 0x6a9   : > { %1509 = shalt.err (!%p1506_p4)
}
 0x6aa   : > { %s1510_s24 = scalar_lea.hbm %s1908_s18, 128  ;;  %s1514_s2 = scalar_lea.hbm %s1954_s8, 256 }
 0x6ab   : > { %p1511_p10 = scmp.ne.s32.totalorder %s1908_s18, %s1510_s24  ;;  %p1515_p11 = scmp.lt.s32.totalorder %s1908_s18, %s1954_s8 }
 0x6ac   : > { %p1516_p2 = scmp.lt.s32.totalorder %s1514_s2, %s1510_s24 }
 0x6ad   : > { %p1512_p0 = pnand %p1511_p10, %p1982_p7 }
 0x6ae   : > { %p1517_p6 = por %p1516_p2, %p1515_p11 }
 0x6af   : > { %p1513_p8 = pneg %p1512_p0 }
 0x6b1   : > { %p1518_p12 = pnand %p1517_p6, %p1513_p8 }
 0x6b3   : > { %1521 = shalt.err (!%p1518_p12)
}
 0x6b4   : > { %1290 = dma.vmem_to_hbm [thread:$0]  (%p1982_p7), %s1044_s17, 128, %s1908_s18, %s1030_s23  }
 0x6b5 PF: > { %s1055_s11 = sand.u32 1, %s1560_s27   ;;  %p1983_p9 = scmp.ne.s32.totalorder %s1966_s12, 0 }
 0x6b6   : > { %p1984_p13 = scmp.ge.s32.totalorder %s1572_s30, 2  ;;  %s1056_s29 = scalar_lea.sflag [#allocation4], %s1055_s11 }
 0x6b8   : > { %p1307_p5 = pnand %p1984_p13, %p1983_p9 }
 0x6ba   : > { %p1308_p1 = pneg %p1307_p5 }
 0x6bc   : > { %1555 = dma.done.wait (%p1308_p1), %s1056_s29, 128  }
 0x6bd   : > { %1557 = vsyncadd (%p1308_p1), %s1056_s29, 4294967168  ;;  %s1985_s30 = sld [smem:[#allocation17_spill]]  ;;  %s1988_s27 = smov %s1564_s28 }
 0x6be   : > { %s1986_s10 = sld [smem:[#allocation16_spill]] }
 0x6bf   : > { %s1987_s29 = sld [smem:[#allocation18_spill]] }
 0x6c3   : > { %p25_p3 = scmp.ge.s32.totalorder %s1985_s30, 4  }
 0x6c4   : > { %s1989_s28 = smov %s1986_s10 }
 0x6c5   :  { %27 = sbr.rel (!%p25_p3) target bundleno = 11 (0xb), region = 118 }
 0x6ca   :  { %1061 = vsyncpa [#allocation3], 1 }
 0x6cb   :  { %1063 = vsyncpa [#allocation3 + $0x1], 1 }
 0x6cc   :  { %1064 = vsyncpa [#allocation6], 1 }
 0x6cd   :  { %1066 = vsyncpa [#allocation6 + $0x1], 1 }
 0x6ce   :  { %1067 = vsyncpa [#allocation9], 1 }
 0x6cf   :  { %1068 = vsyncpa [#allocation4], 1 }
 0x6d0   :  { %1070 = vsyncpa [#allocation4 + $0x1], 1 }

</bundles_post_ra>
